<compile_context>
chip_gen: v7x
topology: tpu7x:2x2x1
jax: 0.10.0
libtpu: 0.0.40
codegen_flags: <defaults>
</compile_context>

<pallas_src>
import math

import jax
import jax.numpy as jnp
from jax.experimental import pallas as pl
from jax.experimental.pallas import tpu as pltpu

# ---------------- config (small, consistent with the module) ----------------
VOCAB = 100
D_MODEL = 32
NUM_LAYERS = 2
NUM_HEADS = 4
D_HEAD = D_MODEL // NUM_HEADS
D_FF = 64
MAX_SEQ = 16
BATCH = 2
SEQ = 8
EPS = 1e-5                       # PyTorch nn.LayerNorm default
EMB_SCALE = math.sqrt(D_MODEL)
ATT_SCALE = 1.0 / math.sqrt(D_HEAD)


# ---------------- in-kernel helpers ----------------
def _layernorm(x, gamma, beta):
    mean = jnp.mean(x, axis=-1, keepdims=True)
    var = jnp.mean(jnp.square(x - mean), axis=-1, keepdims=True)
    return (x - mean) * jax.lax.rsqrt(var + EPS) * gamma + beta


# ---------------- fused Pallas kernel (single invocation, no grid) ----------------
def fused_encoder_kernel(tok_ref, mask_ref, emb_ref, pe_ref,
                         wqkv_ref, wo_ref, w1_ref, w2_ref, norms_ref, o_ref):
    H, B, S, Dh, D, F = NUM_HEADS, BATCH, SEQ, D_HEAD, D_MODEL, D_FF
    N = B * S

    # --- prologue: in-kernel embedding gather (token ids in SMEM, table VMEM-resident,
    #     already pre-scaled by sqrt(d_model)) + positional encoding ---
    rows = []
    for b in range(B):
        for s in range(S):
            rows.append(emb_ref[pl.ds(tok_ref[b, s], 1), :])      # (1, D) dynamic row load
    x = jnp.concatenate(rows, axis=0) + pe_ref[...]               # (N, D) f32

    # --- additive key-padding mask built once from the raw (B, 1, S) mask.
    # NOTE: index order (h*B + b) must stay in sync with split_heads() below. ---
    neg = (mask_ref[...] - 1.0) * 1e9                             # (B, 1, S): 0 keep / -1e9 pad
    add_mask = jnp.concatenate([neg] * H, axis=0)                 # (H*B, 1, S)

    for l in range(NUM_LAYERS):                                   # static unroll over layers
        # ---- fused QKV projection: ONE dense (N, D) @ (D, 3D); bias = last weight row ----
        wqkv = wqkv_ref[l]                                        # (D+1, 3D)
        qkv = jnp.dot(x, wqkv[:D, :],
                      preferred_element_type=jnp.float32) + wqkv[D:, :]       # (N, 3D)

        def split_heads(base):
            # (N, D) column block -> (H*B, S, Dh) via lane slices + leading-axis concat
            parts = [qkv[:, base + h * Dh: base + (h + 1) * Dh].reshape(1, N, Dh)
                     for h in range(H)]
            return jnp.concatenate(parts, axis=0).reshape(H * B, S, Dh)

        qb, kb, vb = split_heads(0), split_heads(D), split_heads(2 * D)

        # ---- scaled-dot-product attention batched over all (head, batch) pairs ----
        scores = jnp.einsum("nqd,nkd->nqk", qb, kb,
                            preferred_element_type=jnp.float32) * ATT_SCALE   # (H*B, S, S)
        scores = scores + add_mask
        m = jnp.max(scores, axis=-1, keepdims=True)
        e = jnp.exp(scores - m)
        p = e * pl.reciprocal(jnp.sum(e, axis=-1, keepdims=True), approx=True)
        ctx = jnp.einsum("nqk,nkd->nqd", p, vb,
                         preferred_element_type=jnp.float32)                  # (H*B, S, Dh)

        # ---- heads -> lanes, then ONE dense (N, D) @ (D, D) output projection ----
        ctx3 = ctx.reshape(H, N, Dh)
        ctx_cat = jnp.concatenate([ctx3[h] for h in range(H)], axis=-1)       # (N, D)
        wo = wo_ref[l]                                                        # (D+1, D)
        attn = jnp.dot(ctx_cat, wo[:D, :],
                       preferred_element_type=jnp.float32) + wo[D:, :]

        # ---- residual + post-LayerNorm 1 (dropout = identity in eval) ----
        x = _layernorm(x + attn, norms_ref[4 * l + 0], norms_ref[4 * l + 1])

        # ---- position-wise feed-forward (ReLU); biases folded as last weight rows ----
        w1 = w1_ref[l]                                                        # (D+1, F)
        w2 = w2_ref[l]                                                        # (F+1, D)
        ff = jnp.maximum(
            jnp.dot(x, w1[:D, :], preferred_element_type=jnp.float32) + w1[D:, :], 0.0)
        ff = jnp.dot(ff, w2[:F, :], preferred_element_type=jnp.float32) + w2[F:, :]

        # ---- residual + post-LayerNorm 2 ----
        x = _layernorm(x + ff, norms_ref[4 * l + 2], norms_ref[4 * l + 3])

    # ---- final LayerNorm + lane-aligned (N, D) store (reshape to (B,S,D) in wrapper) ----
    x = _layernorm(x, norms_ref[4 * NUM_LAYERS], norms_ref[4 * NUM_LAYERS + 1])
    o_ref[...] = x.astype(o_ref.dtype)


# ---------------- weight packing (one-time, outside the hot path) ----------------
def pack_params(params):
    ls = params["layers"]

    def with_bias(w, b):                       # (in, out), (1, out) -> (in+1, out)
        return jnp.concatenate([w, b], axis=0)

    wqkv = jnp.stack([
        with_bias(jnp.concatenate([lp["wq"], lp["wk"], lp["wv"]], axis=1),
                  jnp.concatenate([lp["bq"], lp["bk"], lp["bv"]], axis=1))
        for lp in ls])                                               # (L, D+1, 3D)

    norms = jnp.concatenate(
        [jnp.stack([lp["ln1_g"], lp["ln1_b"], lp["ln2_g"], lp["ln2_b"]]) for lp in ls]
        + [jnp.stack([params["norm_g"], params["norm_b"]])],
        axis=0)                                                      # (4L+2, 1, D)

    return {
        "emb_scaled": params["emb"] * EMB_SCALE,                     # fold sqrt(d_model) once
        "pe": jnp.tile(params["pe"][:SEQ], (BATCH, 1)),              # (B*S, D)
        "wqkv": wqkv,                                                # (L, D+1, 3D)
        "wo": jnp.stack([with_bias(lp["wo"], lp["bo"]) for lp in ls]),   # (L, D+1, D)
        "w1": jnp.stack([with_bias(lp["w1"], lp["b1"]) for lp in ls]),   # (L, D+1, F)
        "w2": jnp.stack([with_bias(lp["w2"], lp["b2"]) for lp in ls]),   # (L, F+1, D)
        "norms": norms,
    }


# ---------------- forward: one grid-less pallas_call, nothing else ----------------
@jax.jit
def transformer_encoder_forward(tokens, src_mask, packed):
    B, S = tokens.shape
    operands = (tokens,                       # (B, S) int32  -> SMEM
                src_mask,                     # (B, 1, S) f32 -> VMEM (raw mask; additive in-kernel)
                packed["emb_scaled"], packed["pe"],
                packed["wqkv"], packed["wo"], packed["w1"], packed["w2"],
                packed["norms"])

    smem = pl.BlockSpec(memory_space=pltpu.MemorySpace.SMEM)
    vmem = pl.BlockSpec(memory_space=pltpu.MemorySpace.VMEM)

    out = pl.pallas_call(
        fused_encoder_kernel,
        out_shape=jax.ShapeDtypeStruct((B * S, D_MODEL), jnp.float32),
        in_specs=[smem] + [vmem] * (len(operands) - 1),
        out_specs=vmem,
    )(*operands)
    return out.reshape(B, S, D_MODEL)


# ---------------- parameter init (deterministic, synthetic) ----------------
def sinusoidal_pe(max_len, d_model):
    pos = jnp.arange(max_len, dtype=jnp.float32)[:, None]
    i = jnp.arange(0, d_model, 2, dtype=jnp.float32)
    div = jnp.exp(-math.log(10000.0) * i / d_model)
    pe = jnp.zeros((max_len, d_model), jnp.float32)
    pe = pe.at[:, 0::2].set(jnp.sin(pos * div))
    pe = pe.at[:, 1::2].set(jnp.cos(pos * div))
    return pe


def init_params(key):
    def normal(k, shape, scale=0.05):
        return (scale * jax.random.normal(k, shape)).astype(jnp.float32)

    keys = iter(jax.random.split(key, 8 + NUM_LAYERS * 16))
    params = {
        "emb": normal(next(keys), (VOCAB, D_MODEL), 1.0),
        "pe": sinusoidal_pe(MAX_SEQ, D_MODEL),
        "norm_g": jnp.ones((1, D_MODEL), jnp.float32),
        "norm_b": jnp.zeros((1, D_MODEL), jnp.float32),
        "layers": [],
    }
    for _ in range(NUM_LAYERS):
        lp = {
            # NOTE: weights stored as (in, out), i.e. nn.Linear.weight.T
            "wq": normal(next(keys), (D_MODEL, D_MODEL)), "bq": normal(next(keys), (1, D_MODEL)),
            "wk": normal(next(keys), (D_MODEL, D_MODEL)), "bk": normal(next(keys), (1, D_MODEL)),
            "wv": normal(next(keys), (D_MODEL, D_MODEL)), "bv": normal(next(keys), (1, D_MODEL)),
            "wo": normal(next(keys), (D_MODEL, D_MODEL)), "bo": normal(next(keys), (1, D_MODEL)),
            "ln1_g": jnp.ones((1, D_MODEL), jnp.float32), "ln1_b": jnp.zeros((1, D_MODEL), jnp.float32),
            "w1": normal(next(keys), (D_MODEL, D_FF)), "b1": normal(next(keys), (1, D_FF)),
            "w2": normal(next(keys), (D_FF, D_MODEL)), "b2": normal(next(keys), (1, D_MODEL)),
            "ln2_g": jnp.ones((1, D_MODEL), jnp.float32), "ln2_b": jnp.zeros((1, D_MODEL), jnp.float32),
        }
        params["layers"].append(lp)
    return params


# ---------------- pure-JAX reference (for a sanity check) ----------------
def reference_forward(tokens, src_mask, params):
    def ln(x, g, b):
        m = jnp.mean(x, -1, keepdims=True)
        v = jnp.mean(jnp.square(x - m), -1, keepdims=True)
        return (x - m) / jnp.sqrt(v + EPS) * g + b

    x = params["emb"][tokens] * math.sqrt(D_MODEL)
    x = x + params["pe"][: tokens.shape[1]][None]
    B, S, D = x.shape
    Dh = D // NUM_HEADS
    for lp in params["layers"]:
        q = (x @ lp["wq"] + lp["bq"]).reshape(B, S, NUM_HEADS, Dh).transpose(0, 2, 1, 3)
        k = (x @ lp["wk"] + lp["bk"]).reshape(B, S, NUM_HEADS, Dh).transpose(0, 2, 1, 3)
        v = (x @ lp["wv"] + lp["bv"]).reshape(B, S, NUM_HEADS, Dh).transpose(0, 2, 1, 3)
        scores = jnp.einsum("bhqd,bhkd->bhqk", q, k) / math.sqrt(Dh)
        scores = jnp.where(src_mask[:, None] == 0, -1e9, scores)
        p = jax.nn.softmax(scores, axis=-1)
        attn = jnp.einsum("bhqk,bhkd->bhqd", p, v).transpose(0, 2, 1, 3).reshape(B, S, D)
        attn = attn @ lp["wo"] + lp["bo"]
        x = ln(x + attn, lp["ln1_g"], lp["ln1_b"])
        ff = jnp.maximum(x @ lp["w1"] + lp["b1"], 0.0) @ lp["w2"] + lp["b2"]
        x = ln(x + ff, lp["ln2_g"], lp["ln2_b"])
    return ln(x, params["norm_g"], params["norm_b"])


# ---------------- main ----------------
if __name__ == "__main__":
    key = jax.random.PRNGKey(0)
    pkey, tkey = jax.random.split(key)
    params = init_params(pkey)
    packed = pack_params(params)          # one-time weight repacking (fused QKV, folded biases)

    tokens = jax.random.randint(tkey, (BATCH, SEQ), 0, VOCAB, dtype=jnp.int32)
    # src_mask: batch 1 has its last two key positions padded out.
    src_mask = jnp.ones((BATCH, 1, SEQ), jnp.float32)
    src_mask = src_mask.at[1, 0, SEQ - 2:].set(0.0)

    out = transformer_encoder_forward(tokens, src_mask, packed)
    out = jax.block_until_ready(out)

    ref = reference_forward(tokens, src_mask, params)
    if not jnp.allclose(out, ref, atol=2e-2, rtol=2e-2):
        raise AssertionError("Pallas output mismatch vs reference")

    print("KERNEL_OK")
</pallas_src>

<mosaic_0001>
module attributes {stable_mosaic.version = 11 : i64} {
  func.func @fused_encoder_kernel(%arg0: memref<2x8xi32, #tpu.memory_space<smem>>, %arg1: memref<2x1x8xf32, #tpu.memory_space<vmem>>, %arg2: memref<100x32xf32, #tpu.memory_space<vmem>>, %arg3: memref<16x32xf32, #tpu.memory_space<vmem>>, %arg4: memref<2x33x96xf32, #tpu.memory_space<vmem>>, %arg5: memref<2x33x32xf32, #tpu.memory_space<vmem>>, %arg6: memref<2x33x64xf32, #tpu.memory_space<vmem>>, %arg7: memref<2x65x32xf32, #tpu.memory_space<vmem>>, %arg8: memref<10x1x32xf32, #tpu.memory_space<vmem>>, %arg9: memref<16x32xf32, #tpu.memory_space<vmem>>) attributes {dimension_semantics = [], scalar_prefetch = 0 : i64, scratch_operands = 0 : i64, tpu.core_type = #tpu.core_type<tc>} {
    %c0 = arith.constant 0 : index
    %c0_0 = arith.constant 0 : index
    %0 = memref.load %arg0[%c0, %c0_0] : memref<2x8xi32, #tpu.memory_space<smem>>
    %1 = arith.index_cast %0 : i32 to index
    %c0_1 = arith.constant 0 : index
    %2 = vector.load %arg2[%1, %c0_1] : memref<100x32xf32, #tpu.memory_space<vmem>>, vector<1x32xf32>
    %c0_2 = arith.constant 0 : index
    %c1 = arith.constant 1 : index
    %3 = memref.load %arg0[%c0_2, %c1] : memref<2x8xi32, #tpu.memory_space<smem>>
    %4 = arith.index_cast %3 : i32 to index
    %c0_3 = arith.constant 0 : index
    %5 = vector.load %arg2[%4, %c0_3] : memref<100x32xf32, #tpu.memory_space<vmem>>, vector<1x32xf32>
    %c0_4 = arith.constant 0 : index
    %c2 = arith.constant 2 : index
    %6 = memref.load %arg0[%c0_4, %c2] : memref<2x8xi32, #tpu.memory_space<smem>>
    %7 = arith.index_cast %6 : i32 to index
    %c0_5 = arith.constant 0 : index
    %8 = vector.load %arg2[%7, %c0_5] : memref<100x32xf32, #tpu.memory_space<vmem>>, vector<1x32xf32>
    %c0_6 = arith.constant 0 : index
    %c3 = arith.constant 3 : index
    %9 = memref.load %arg0[%c0_6, %c3] : memref<2x8xi32, #tpu.memory_space<smem>>
    %10 = arith.index_cast %9 : i32 to index
    %c0_7 = arith.constant 0 : index
    %11 = vector.load %arg2[%10, %c0_7] : memref<100x32xf32, #tpu.memory_space<vmem>>, vector<1x32xf32>
    %c0_8 = arith.constant 0 : index
    %c4 = arith.constant 4 : index
    %12 = memref.load %arg0[%c0_8, %c4] : memref<2x8xi32, #tpu.memory_space<smem>>
    %13 = arith.index_cast %12 : i32 to index
    %c0_9 = arith.constant 0 : index
    %14 = vector.load %arg2[%13, %c0_9] : memref<100x32xf32, #tpu.memory_space<vmem>>, vector<1x32xf32>
    %c0_10 = arith.constant 0 : index
    %c5 = arith.constant 5 : index
    %15 = memref.load %arg0[%c0_10, %c5] : memref<2x8xi32, #tpu.memory_space<smem>>
    %16 = arith.index_cast %15 : i32 to index
    %c0_11 = arith.constant 0 : index
    %17 = vector.load %arg2[%16, %c0_11] : memref<100x32xf32, #tpu.memory_space<vmem>>, vector<1x32xf32>
    %c0_12 = arith.constant 0 : index
    %c6 = arith.constant 6 : index
    %18 = memref.load %arg0[%c0_12, %c6] : memref<2x8xi32, #tpu.memory_space<smem>>
    %19 = arith.index_cast %18 : i32 to index
    %c0_13 = arith.constant 0 : index
    %20 = vector.load %arg2[%19, %c0_13] : memref<100x32xf32, #tpu.memory_space<vmem>>, vector<1x32xf32>
    %c0_14 = arith.constant 0 : index
    %c7 = arith.constant 7 : index
    %21 = memref.load %arg0[%c0_14, %c7] : memref<2x8xi32, #tpu.memory_space<smem>>
    %22 = arith.index_cast %21 : i32 to index
    %c0_15 = arith.constant 0 : index
    %23 = vector.load %arg2[%22, %c0_15] : memref<100x32xf32, #tpu.memory_space<vmem>>, vector<1x32xf32>
    %c1_16 = arith.constant 1 : index
    %c0_17 = arith.constant 0 : index
    %24 = memref.load %arg0[%c1_16, %c0_17] : memref<2x8xi32, #tpu.memory_space<smem>>
    %25 = arith.index_cast %24 : i32 to index
    %c0_18 = arith.constant 0 : index
    %26 = vector.load %arg2[%25, %c0_18] : memref<100x32xf32, #tpu.memory_space<vmem>>, vector<1x32xf32>
    %c1_19 = arith.constant 1 : index
    %c1_20 = arith.constant 1 : index
    %27 = memref.load %arg0[%c1_19, %c1_20] : memref<2x8xi32, #tpu.memory_space<smem>>
    %28 = arith.index_cast %27 : i32 to index
    %c0_21 = arith.constant 0 : index
    %29 = vector.load %arg2[%28, %c0_21] : memref<100x32xf32, #tpu.memory_space<vmem>>, vector<1x32xf32>
    %c1_22 = arith.constant 1 : index
    %c2_23 = arith.constant 2 : index
    %30 = memref.load %arg0[%c1_22, %c2_23] : memref<2x8xi32, #tpu.memory_space<smem>>
    %31 = arith.index_cast %30 : i32 to index
    %c0_24 = arith.constant 0 : index
    %32 = vector.load %arg2[%31, %c0_24] : memref<100x32xf32, #tpu.memory_space<vmem>>, vector<1x32xf32>
    %c1_25 = arith.constant 1 : index
    %c3_26 = arith.constant 3 : index
    %33 = memref.load %arg0[%c1_25, %c3_26] : memref<2x8xi32, #tpu.memory_space<smem>>
    %34 = arith.index_cast %33 : i32 to index
    %c0_27 = arith.constant 0 : index
    %35 = vector.load %arg2[%34, %c0_27] : memref<100x32xf32, #tpu.memory_space<vmem>>, vector<1x32xf32>
    %c1_28 = arith.constant 1 : index
    %c4_29 = arith.constant 4 : index
    %36 = memref.load %arg0[%c1_28, %c4_29] : memref<2x8xi32, #tpu.memory_space<smem>>
    %37 = arith.index_cast %36 : i32 to index
    %c0_30 = arith.constant 0 : index
    %38 = vector.load %arg2[%37, %c0_30] : memref<100x32xf32, #tpu.memory_space<vmem>>, vector<1x32xf32>
    %c1_31 = arith.constant 1 : index
    %c5_32 = arith.constant 5 : index
    %39 = memref.load %arg0[%c1_31, %c5_32] : memref<2x8xi32, #tpu.memory_space<smem>>
    %40 = arith.index_cast %39 : i32 to index
    %c0_33 = arith.constant 0 : index
    %41 = vector.load %arg2[%40, %c0_33] : memref<100x32xf32, #tpu.memory_space<vmem>>, vector<1x32xf32>
    %c1_34 = arith.constant 1 : index
    %c6_35 = arith.constant 6 : index
    %42 = memref.load %arg0[%c1_34, %c6_35] : memref<2x8xi32, #tpu.memory_space<smem>>
    %43 = arith.index_cast %42 : i32 to index
    %c0_36 = arith.constant 0 : index
    %44 = vector.load %arg2[%43, %c0_36] : memref<100x32xf32, #tpu.memory_space<vmem>>, vector<1x32xf32>
    %c1_37 = arith.constant 1 : index
    %c7_38 = arith.constant 7 : index
    %45 = memref.load %arg0[%c1_37, %c7_38] : memref<2x8xi32, #tpu.memory_space<smem>>
    %46 = arith.index_cast %45 : i32 to index
    %c0_39 = arith.constant 0 : index
    %47 = vector.load %arg2[%46, %c0_39] : memref<100x32xf32, #tpu.memory_space<vmem>>, vector<1x32xf32>
    %48 = tpu.concatenate %2, %5, %8, %11, %14, %17, %20, %23, %26, %29, %32, %35, %38, %41, %44, %47 in 0 : vector<1x32xf32>, vector<1x32xf32>, vector<1x32xf32>, vector<1x32xf32>, vector<1x32xf32>, vector<1x32xf32>, vector<1x32xf32>, vector<1x32xf32>, vector<1x32xf32>, vector<1x32xf32>, vector<1x32xf32>, vector<1x32xf32>, vector<1x32xf32>, vector<1x32xf32>, vector<1x32xf32>, vector<1x32xf32> -> vector<16x32xf32>
    %c0_40 = arith.constant 0 : index
    %c0_41 = arith.constant 0 : index
    %49 = vector.load %arg3[%c0_40, %c0_41] : memref<16x32xf32, #tpu.memory_space<vmem>>, vector<16x32xf32>
    %50 = arith.addf %48, %49 : vector<16x32xf32>
    %c0_42 = arith.constant 0 : index
    %c0_43 = arith.constant 0 : index
    %c0_44 = arith.constant 0 : index
    %51 = vector.load %arg1[%c0_42, %c0_43, %c0_44] : memref<2x1x8xf32, #tpu.memory_space<vmem>>, vector<2x1x8xf32>
    %cst = arith.constant 1.000000e+00 : f32
    %52 = vector.broadcast %cst : f32 to vector<2x1x8xf32>
    %53 = arith.subf %51, %52 : vector<2x1x8xf32>
    %cst_45 = arith.constant 1.000000e+09 : f32
    %54 = vector.broadcast %cst_45 : f32 to vector<2x1x8xf32>
    %55 = arith.mulf %53, %54 : vector<2x1x8xf32>
    %56 = tpu.concatenate %55, %55, %55, %55 in 0 : vector<2x1x8xf32>, vector<2x1x8xf32>, vector<2x1x8xf32>, vector<2x1x8xf32> -> vector<8x1x8xf32>
    %c0_46 = arith.constant 0 : index
    %c0_47 = arith.constant 0 : index
    %c0_48 = arith.constant 0 : index
    %57 = vector.load %arg4[%c0_46, %c0_47, %c0_48] : memref<2x33x96xf32, #tpu.memory_space<vmem>>, vector<1x33x96xf32>
    %58 = vector.shape_cast %57 : vector<1x33x96xf32> to vector<33x96xf32>
    %59 = vector.extract_strided_slice %58 {offsets = [0, 0], sizes = [32, 96], strides = [1, 1]} : vector<33x96xf32> to vector<32x96xf32>
    %cst_49 = arith.constant dense<0.000000e+00> : vector<16x96xf32>
    %60 = tpu.matmul %50, %59, %cst_49 {dimension_numbers = #tpu.dot_dimension_numbers<[1], [0], [0], [1], [0, 0, 1, 1], [], []>} : vector<16x32xf32>, vector<32x96xf32>, vector<16x96xf32> -> vector<16x96xf32>
    %61 = vector.extract_strided_slice %58 {offsets = [32, 0], sizes = [1, 96], strides = [1, 1]} : vector<33x96xf32> to vector<1x96xf32>
    %62 = vector.broadcast %61 : vector<1x96xf32> to vector<16x96xf32>
    %63 = arith.addf %60, %62 : vector<16x96xf32>
    %64 = vector.extract_strided_slice %63 {offsets = [0, 0], sizes = [16, 8], strides = [1, 1]} : vector<16x96xf32> to vector<16x8xf32>
    %65 = vector.shape_cast %64 : vector<16x8xf32> to vector<1x16x8xf32>
    %66 = vector.extract_strided_slice %63 {offsets = [0, 8], sizes = [16, 8], strides = [1, 1]} : vector<16x96xf32> to vector<16x8xf32>
    %67 = vector.shape_cast %66 : vector<16x8xf32> to vector<1x16x8xf32>
    %68 = vector.extract_strided_slice %63 {offsets = [0, 16], sizes = [16, 8], strides = [1, 1]} : vector<16x96xf32> to vector<16x8xf32>
    %69 = vector.shape_cast %68 : vector<16x8xf32> to vector<1x16x8xf32>
    %70 = vector.extract_strided_slice %63 {offsets = [0, 24], sizes = [16, 8], strides = [1, 1]} : vector<16x96xf32> to vector<16x8xf32>
    %71 = vector.shape_cast %70 : vector<16x8xf32> to vector<1x16x8xf32>
    %72 = tpu.concatenate %65, %67, %69, %71 in 0 : vector<1x16x8xf32>, vector<1x16x8xf32>, vector<1x16x8xf32>, vector<1x16x8xf32> -> vector<4x16x8xf32>
    %73 = vector.shape_cast %72 : vector<4x16x8xf32> to vector<8x8x8xf32>
    %74 = vector.extract_strided_slice %63 {offsets = [0, 32], sizes = [16, 8], strides = [1, 1]} : vector<16x96xf32> to vector<16x8xf32>
    %75 = vector.shape_cast %74 : vector<16x8xf32> to vector<1x16x8xf32>
    %76 = vector.extract_strided_slice %63 {offsets = [0, 40], sizes = [16, 8], strides = [1, 1]} : vector<16x96xf32> to vector<16x8xf32>
    %77 = vector.shape_cast %76 : vector<16x8xf32> to vector<1x16x8xf32>
    %78 = vector.extract_strided_slice %63 {offsets = [0, 48], sizes = [16, 8], strides = [1, 1]} : vector<16x96xf32> to vector<16x8xf32>
    %79 = vector.shape_cast %78 : vector<16x8xf32> to vector<1x16x8xf32>
    %80 = vector.extract_strided_slice %63 {offsets = [0, 56], sizes = [16, 8], strides = [1, 1]} : vector<16x96xf32> to vector<16x8xf32>
    %81 = vector.shape_cast %80 : vector<16x8xf32> to vector<1x16x8xf32>
    %82 = tpu.concatenate %75, %77, %79, %81 in 0 : vector<1x16x8xf32>, vector<1x16x8xf32>, vector<1x16x8xf32>, vector<1x16x8xf32> -> vector<4x16x8xf32>
    %83 = vector.shape_cast %82 : vector<4x16x8xf32> to vector<8x8x8xf32>
    %84 = vector.extract_strided_slice %63 {offsets = [0, 64], sizes = [16, 8], strides = [1, 1]} : vector<16x96xf32> to vector<16x8xf32>
    %85 = vector.shape_cast %84 : vector<16x8xf32> to vector<1x16x8xf32>
    %86 = vector.extract_strided_slice %63 {offsets = [0, 72], sizes = [16, 8], strides = [1, 1]} : vector<16x96xf32> to vector<16x8xf32>
    %87 = vector.shape_cast %86 : vector<16x8xf32> to vector<1x16x8xf32>
    %88 = vector.extract_strided_slice %63 {offsets = [0, 80], sizes = [16, 8], strides = [1, 1]} : vector<16x96xf32> to vector<16x8xf32>
    %89 = vector.shape_cast %88 : vector<16x8xf32> to vector<1x16x8xf32>
    %90 = vector.extract_strided_slice %63 {offsets = [0, 88], sizes = [16, 8], strides = [1, 1]} : vector<16x96xf32> to vector<16x8xf32>
    %91 = vector.shape_cast %90 : vector<16x8xf32> to vector<1x16x8xf32>
    %92 = tpu.concatenate %85, %87, %89, %91 in 0 : vector<1x16x8xf32>, vector<1x16x8xf32>, vector<1x16x8xf32>, vector<1x16x8xf32> -> vector<4x16x8xf32>
    %93 = vector.shape_cast %92 : vector<4x16x8xf32> to vector<8x8x8xf32>
    "tpu.trace_start"() <{level = 10 : i32, message = "nqd,nkd->nqk"}> : () -> ()
    %cst_50 = arith.constant dense<0.000000e+00> : vector<8x8x8xf32>
    %94 = tpu.matmul %73, %83, %cst_50 {dimension_numbers = #tpu.dot_dimension_numbers<[2], [2], [1], [1], [0, 0, 0, 1, 1, 1], [0], [0]>} : vector<8x8x8xf32>, vector<8x8x8xf32>, vector<8x8x8xf32> -> vector<8x8x8xf32>
    "tpu.trace_stop"() : () -> ()
    %cst_51 = arith.constant 0.353553385 : f32
    %95 = vector.broadcast %cst_51 : f32 to vector<8x8x8xf32>
    %96 = arith.mulf %94, %95 : vector<8x8x8xf32>
    %97 = vector.broadcast %56 : vector<8x1x8xf32> to vector<8x8x8xf32>
    %98 = arith.addf %96, %97 : vector<8x8x8xf32>
    %cst_52 = arith.constant dense<0xFF800000> : vector<8x8xf32>
    %99 = vector.multi_reduction <maximumf>, %98, %cst_52 [2] : vector<8x8x8xf32> to vector<8x8xf32>
    %100 = vector.shape_cast %99 : vector<8x8xf32> to vector<8x8x1xf32>
    %101 = vector.broadcast %100 : vector<8x8x1xf32> to vector<8x8x8xf32>
    %102 = arith.subf %98, %101 : vector<8x8x8xf32>
    %103 = math.exp %102 : vector<8x8x8xf32>
    %cst_53 = arith.constant dense<0.000000e+00> : vector<8x8xf32>
    %104 = vector.multi_reduction <add>, %103, %cst_53 [2] : vector<8x8x8xf32> to vector<8x8xf32>
    %105 = vector.shape_cast %104 : vector<8x8xf32> to vector<8x8x1xf32>
    %106 = tpu.reciprocal %105 {approx = true} : vector<8x8x1xf32> -> vector<8x8x1xf32>
    %107 = vector.broadcast %106 : vector<8x8x1xf32> to vector<8x8x8xf32>
    %108 = arith.mulf %103, %107 : vector<8x8x8xf32>
    "tpu.trace_start"() <{level = 10 : i32, message = "nqk,nkd->nqd"}> : () -> ()
    %cst_54 = arith.constant dense<0.000000e+00> : vector<8x8x8xf32>
    %109 = tpu.matmul %108, %93, %cst_54 {dimension_numbers = #tpu.dot_dimension_numbers<[2], [1], [1], [2], [0, 0, 0, 1, 1, 2], [0], [0]>} : vector<8x8x8xf32>, vector<8x8x8xf32>, vector<8x8x8xf32> -> vector<8x8x8xf32>
    "tpu.trace_stop"() : () -> ()
    %110 = vector.shape_cast %109 : vector<8x8x8xf32> to vector<4x16x8xf32>
    %111 = vector.extract_strided_slice %110 {offsets = [0, 0, 0], sizes = [1, 16, 8], strides = [1, 1, 1]} : vector<4x16x8xf32> to vector<1x16x8xf32>
    %112 = vector.shape_cast %111 : vector<1x16x8xf32> to vector<16x8xf32>
    %113 = vector.extract_strided_slice %110 {offsets = [1, 0, 0], sizes = [1, 16, 8], strides = [1, 1, 1]} : vector<4x16x8xf32> to vector<1x16x8xf32>
    %114 = vector.shape_cast %113 : vector<1x16x8xf32> to vector<16x8xf32>
    %115 = vector.extract_strided_slice %110 {offsets = [2, 0, 0], sizes = [1, 16, 8], strides = [1, 1, 1]} : vector<4x16x8xf32> to vector<1x16x8xf32>
    %116 = vector.shape_cast %115 : vector<1x16x8xf32> to vector<16x8xf32>
    %117 = vector.extract_strided_slice %110 {offsets = [3, 0, 0], sizes = [1, 16, 8], strides = [1, 1, 1]} : vector<4x16x8xf32> to vector<1x16x8xf32>
    %118 = vector.shape_cast %117 : vector<1x16x8xf32> to vector<16x8xf32>
    %119 = tpu.concatenate %112, %114, %116, %118 in 1 : vector<16x8xf32>, vector<16x8xf32>, vector<16x8xf32>, vector<16x8xf32> -> vector<16x32xf32>
    %c0_55 = arith.constant 0 : index
    %c0_56 = arith.constant 0 : index
    %c0_57 = arith.constant 0 : index
    %120 = vector.load %arg5[%c0_55, %c0_56, %c0_57] : memref<2x33x32xf32, #tpu.memory_space<vmem>>, vector<1x33x32xf32>
    %121 = vector.shape_cast %120 : vector<1x33x32xf32> to vector<33x32xf32>
    %122 = vector.extract_strided_slice %121 {offsets = [0, 0], sizes = [32, 32], strides = [1, 1]} : vector<33x32xf32> to vector<32x32xf32>
    %cst_58 = arith.constant dense<0.000000e+00> : vector<16x32xf32>
    %123 = tpu.matmul %119, %122, %cst_58 {dimension_numbers = #tpu.dot_dimension_numbers<[1], [0], [0], [1], [0, 0, 1, 1], [], []>} : vector<16x32xf32>, vector<32x32xf32>, vector<16x32xf32> -> vector<16x32xf32>
    %124 = vector.extract_strided_slice %121 {offsets = [32, 0], sizes = [1, 32], strides = [1, 1]} : vector<33x32xf32> to vector<1x32xf32>
    %125 = vector.broadcast %124 : vector<1x32xf32> to vector<16x32xf32>
    %126 = arith.addf %123, %125 : vector<16x32xf32>
    %127 = arith.addf %50, %126 : vector<16x32xf32>
    %c0_59 = arith.constant 0 : index
    %c0_60 = arith.constant 0 : index
    %c0_61 = arith.constant 0 : index
    %128 = vector.load %arg8[%c0_59, %c0_60, %c0_61] : memref<10x1x32xf32, #tpu.memory_space<vmem>>, vector<1x1x32xf32>
    %129 = vector.shape_cast %128 : vector<1x1x32xf32> to vector<1x32xf32>
    %c1_62 = arith.constant 1 : index
    %c0_63 = arith.constant 0 : index
    %c0_64 = arith.constant 0 : index
    %130 = vector.load %arg8[%c1_62, %c0_63, %c0_64] : memref<10x1x32xf32, #tpu.memory_space<vmem>>, vector<1x1x32xf32>
    %131 = vector.shape_cast %130 : vector<1x1x32xf32> to vector<1x32xf32>
    %cst_65 = arith.constant dense<0.000000e+00> : vector<16xf32>
    %132 = vector.multi_reduction <add>, %127, %cst_65 [1] : vector<16x32xf32> to vector<16xf32>
    %133 = vector.shape_cast %132 : vector<16xf32> to vector<16x1xf32>
    %cst_66 = arith.constant 3.200000e+01 : f32
    %134 = vector.broadcast %cst_66 : f32 to vector<16x1xf32>
    %135 = arith.divf %133, %134 : vector<16x1xf32>
    %136 = vector.broadcast %135 : vector<16x1xf32> to vector<16x32xf32>
    %137 = arith.subf %127, %136 : vector<16x32xf32>
    %138 = arith.mulf %137, %137 : vector<16x32xf32>
    %cst_67 = arith.constant dense<0.000000e+00> : vector<16xf32>
    %139 = vector.multi_reduction <add>, %138, %cst_67 [1] : vector<16x32xf32> to vector<16xf32>
    %140 = vector.shape_cast %139 : vector<16xf32> to vector<16x1xf32>
    %cst_68 = arith.constant 3.200000e+01 : f32
    %141 = vector.broadcast %cst_68 : f32 to vector<16x1xf32>
    %142 = arith.divf %140, %141 : vector<16x1xf32>
    %143 = vector.broadcast %135 : vector<16x1xf32> to vector<16x32xf32>
    %144 = arith.subf %127, %143 : vector<16x32xf32>
    %cst_69 = arith.constant 9.99999974E-6 : f32
    %145 = vector.broadcast %cst_69 : f32 to vector<16x1xf32>
    %146 = arith.addf %142, %145 : vector<16x1xf32>
    %147 = math.rsqrt %146 : vector<16x1xf32>
    %148 = vector.broadcast %147 : vector<16x1xf32> to vector<16x32xf32>
    %149 = arith.mulf %144, %148 : vector<16x32xf32>
    %150 = vector.broadcast %129 : vector<1x32xf32> to vector<16x32xf32>
    %151 = arith.mulf %149, %150 : vector<16x32xf32>
    %152 = vector.broadcast %131 : vector<1x32xf32> to vector<16x32xf32>
    %153 = arith.addf %151, %152 : vector<16x32xf32>
    %c0_70 = arith.constant 0 : index
    %c0_71 = arith.constant 0 : index
    %c0_72 = arith.constant 0 : index
    %154 = vector.load %arg6[%c0_70, %c0_71, %c0_72] : memref<2x33x64xf32, #tpu.memory_space<vmem>>, vector<1x33x64xf32>
    %155 = vector.shape_cast %154 : vector<1x33x64xf32> to vector<33x64xf32>
    %c0_73 = arith.constant 0 : index
    %c0_74 = arith.constant 0 : index
    %c0_75 = arith.constant 0 : index
    %156 = vector.load %arg7[%c0_73, %c0_74, %c0_75] : memref<2x65x32xf32, #tpu.memory_space<vmem>>, vector<1x65x32xf32>
    %157 = vector.shape_cast %156 : vector<1x65x32xf32> to vector<65x32xf32>
    %158 = vector.extract_strided_slice %155 {offsets = [0, 0], sizes = [32, 64], strides = [1, 1]} : vector<33x64xf32> to vector<32x64xf32>
    %cst_76 = arith.constant dense<0.000000e+00> : vector<16x64xf32>
    %159 = tpu.matmul %153, %158, %cst_76 {dimension_numbers = #tpu.dot_dimension_numbers<[1], [0], [0], [1], [0, 0, 1, 1], [], []>} : vector<16x32xf32>, vector<32x64xf32>, vector<16x64xf32> -> vector<16x64xf32>
    %160 = vector.extract_strided_slice %155 {offsets = [32, 0], sizes = [1, 64], strides = [1, 1]} : vector<33x64xf32> to vector<1x64xf32>
    %161 = vector.broadcast %160 : vector<1x64xf32> to vector<16x64xf32>
    %162 = arith.addf %159, %161 : vector<16x64xf32>
    %cst_77 = arith.constant 0.000000e+00 : f32
    %163 = vector.broadcast %cst_77 : f32 to vector<16x64xf32>
    %164 = arith.maximumf %162, %163 : vector<16x64xf32>
    %165 = vector.extract_strided_slice %157 {offsets = [0, 0], sizes = [64, 32], strides = [1, 1]} : vector<65x32xf32> to vector<64x32xf32>
    %cst_78 = arith.constant dense<0.000000e+00> : vector<16x32xf32>
    %166 = tpu.matmul %164, %165, %cst_78 {dimension_numbers = #tpu.dot_dimension_numbers<[1], [0], [0], [1], [0, 0, 1, 1], [], []>} : vector<16x64xf32>, vector<64x32xf32>, vector<16x32xf32> -> vector<16x32xf32>
    %167 = vector.extract_strided_slice %157 {offsets = [64, 0], sizes = [1, 32], strides = [1, 1]} : vector<65x32xf32> to vector<1x32xf32>
    %168 = vector.broadcast %167 : vector<1x32xf32> to vector<16x32xf32>
    %169 = arith.addf %166, %168 : vector<16x32xf32>
    %170 = arith.addf %153, %169 : vector<16x32xf32>
    %c2_79 = arith.constant 2 : index
    %c0_80 = arith.constant 0 : index
    %c0_81 = arith.constant 0 : index
    %171 = vector.load %arg8[%c2_79, %c0_80, %c0_81] : memref<10x1x32xf32, #tpu.memory_space<vmem>>, vector<1x1x32xf32>
    %172 = vector.shape_cast %171 : vector<1x1x32xf32> to vector<1x32xf32>
    %c3_82 = arith.constant 3 : index
    %c0_83 = arith.constant 0 : index
    %c0_84 = arith.constant 0 : index
    %173 = vector.load %arg8[%c3_82, %c0_83, %c0_84] : memref<10x1x32xf32, #tpu.memory_space<vmem>>, vector<1x1x32xf32>
    %174 = vector.shape_cast %173 : vector<1x1x32xf32> to vector<1x32xf32>
    %cst_85 = arith.constant dense<0.000000e+00> : vector<16xf32>
    %175 = vector.multi_reduction <add>, %170, %cst_85 [1] : vector<16x32xf32> to vector<16xf32>
    %176 = vector.shape_cast %175 : vector<16xf32> to vector<16x1xf32>
    %cst_86 = arith.constant 3.200000e+01 : f32
    %177 = vector.broadcast %cst_86 : f32 to vector<16x1xf32>
    %178 = arith.divf %176, %177 : vector<16x1xf32>
    %179 = vector.broadcast %178 : vector<16x1xf32> to vector<16x32xf32>
    %180 = arith.subf %170, %179 : vector<16x32xf32>
    %181 = arith.mulf %180, %180 : vector<16x32xf32>
    %cst_87 = arith.constant dense<0.000000e+00> : vector<16xf32>
    %182 = vector.multi_reduction <add>, %181, %cst_87 [1] : vector<16x32xf32> to vector<16xf32>
    %183 = vector.shape_cast %182 : vector<16xf32> to vector<16x1xf32>
    %cst_88 = arith.constant 3.200000e+01 : f32
    %184 = vector.broadcast %cst_88 : f32 to vector<16x1xf32>
    %185 = arith.divf %183, %184 : vector<16x1xf32>
    %186 = vector.broadcast %178 : vector<16x1xf32> to vector<16x32xf32>
    %187 = arith.subf %170, %186 : vector<16x32xf32>
    %cst_89 = arith.constant 9.99999974E-6 : f32
    %188 = vector.broadcast %cst_89 : f32 to vector<16x1xf32>
    %189 = arith.addf %185, %188 : vector<16x1xf32>
    %190 = math.rsqrt %189 : vector<16x1xf32>
    %191 = vector.broadcast %190 : vector<16x1xf32> to vector<16x32xf32>
    %192 = arith.mulf %187, %191 : vector<16x32xf32>
    %193 = vector.broadcast %172 : vector<1x32xf32> to vector<16x32xf32>
    %194 = arith.mulf %192, %193 : vector<16x32xf32>
    %195 = vector.broadcast %174 : vector<1x32xf32> to vector<16x32xf32>
    %196 = arith.addf %194, %195 : vector<16x32xf32>
    %c1_90 = arith.constant 1 : index
    %c0_91 = arith.constant 0 : index
    %c0_92 = arith.constant 0 : index
    %197 = vector.load %arg4[%c1_90, %c0_91, %c0_92] : memref<2x33x96xf32, #tpu.memory_space<vmem>>, vector<1x33x96xf32>
    %198 = vector.shape_cast %197 : vector<1x33x96xf32> to vector<33x96xf32>
    %199 = vector.extract_strided_slice %198 {offsets = [0, 0], sizes = [32, 96], strides = [1, 1]} : vector<33x96xf32> to vector<32x96xf32>
    %cst_93 = arith.constant dense<0.000000e+00> : vector<16x96xf32>
    %200 = tpu.matmul %196, %199, %cst_93 {dimension_numbers = #tpu.dot_dimension_numbers<[1], [0], [0], [1], [0, 0, 1, 1], [], []>} : vector<16x32xf32>, vector<32x96xf32>, vector<16x96xf32> -> vector<16x96xf32>
    %201 = vector.extract_strided_slice %198 {offsets = [32, 0], sizes = [1, 96], strides = [1, 1]} : vector<33x96xf32> to vector<1x96xf32>
    %202 = vector.broadcast %201 : vector<1x96xf32> to vector<16x96xf32>
    %203 = arith.addf %200, %202 : vector<16x96xf32>
    %204 = vector.extract_strided_slice %203 {offsets = [0, 0], sizes = [16, 8], strides = [1, 1]} : vector<16x96xf32> to vector<16x8xf32>
    %205 = vector.shape_cast %204 : vector<16x8xf32> to vector<1x16x8xf32>
    %206 = vector.extract_strided_slice %203 {offsets = [0, 8], sizes = [16, 8], strides = [1, 1]} : vector<16x96xf32> to vector<16x8xf32>
    %207 = vector.shape_cast %206 : vector<16x8xf32> to vector<1x16x8xf32>
    %208 = vector.extract_strided_slice %203 {offsets = [0, 16], sizes = [16, 8], strides = [1, 1]} : vector<16x96xf32> to vector<16x8xf32>
    %209 = vector.shape_cast %208 : vector<16x8xf32> to vector<1x16x8xf32>
    %210 = vector.extract_strided_slice %203 {offsets = [0, 24], sizes = [16, 8], strides = [1, 1]} : vector<16x96xf32> to vector<16x8xf32>
    %211 = vector.shape_cast %210 : vector<16x8xf32> to vector<1x16x8xf32>
    %212 = tpu.concatenate %205, %207, %209, %211 in 0 : vector<1x16x8xf32>, vector<1x16x8xf32>, vector<1x16x8xf32>, vector<1x16x8xf32> -> vector<4x16x8xf32>
    %213 = vector.shape_cast %212 : vector<4x16x8xf32> to vector<8x8x8xf32>
    %214 = vector.extract_strided_slice %203 {offsets = [0, 32], sizes = [16, 8], strides = [1, 1]} : vector<16x96xf32> to vector<16x8xf32>
    %215 = vector.shape_cast %214 : vector<16x8xf32> to vector<1x16x8xf32>
    %216 = vector.extract_strided_slice %203 {offsets = [0, 40], sizes = [16, 8], strides = [1, 1]} : vector<16x96xf32> to vector<16x8xf32>
    %217 = vector.shape_cast %216 : vector<16x8xf32> to vector<1x16x8xf32>
    %218 = vector.extract_strided_slice %203 {offsets = [0, 48], sizes = [16, 8], strides = [1, 1]} : vector<16x96xf32> to vector<16x8xf32>
    %219 = vector.shape_cast %218 : vector<16x8xf32> to vector<1x16x8xf32>
    %220 = vector.extract_strided_slice %203 {offsets = [0, 56], sizes = [16, 8], strides = [1, 1]} : vector<16x96xf32> to vector<16x8xf32>
    %221 = vector.shape_cast %220 : vector<16x8xf32> to vector<1x16x8xf32>
    %222 = tpu.concatenate %215, %217, %219, %221 in 0 : vector<1x16x8xf32>, vector<1x16x8xf32>, vector<1x16x8xf32>, vector<1x16x8xf32> -> vector<4x16x8xf32>
    %223 = vector.shape_cast %222 : vector<4x16x8xf32> to vector<8x8x8xf32>
    %224 = vector.extract_strided_slice %203 {offsets = [0, 64], sizes = [16, 8], strides = [1, 1]} : vector<16x96xf32> to vector<16x8xf32>
    %225 = vector.shape_cast %224 : vector<16x8xf32> to vector<1x16x8xf32>
    %226 = vector.extract_strided_slice %203 {offsets = [0, 72], sizes = [16, 8], strides = [1, 1]} : vector<16x96xf32> to vector<16x8xf32>
    %227 = vector.shape_cast %226 : vector<16x8xf32> to vector<1x16x8xf32>
    %228 = vector.extract_strided_slice %203 {offsets = [0, 80], sizes = [16, 8], strides = [1, 1]} : vector<16x96xf32> to vector<16x8xf32>
    %229 = vector.shape_cast %228 : vector<16x8xf32> to vector<1x16x8xf32>
    %230 = vector.extract_strided_slice %203 {offsets = [0, 88], sizes = [16, 8], strides = [1, 1]} : vector<16x96xf32> to vector<16x8xf32>
    %231 = vector.shape_cast %230 : vector<16x8xf32> to vector<1x16x8xf32>
    %232 = tpu.concatenate %225, %227, %229, %231 in 0 : vector<1x16x8xf32>, vector<1x16x8xf32>, vector<1x16x8xf32>, vector<1x16x8xf32> -> vector<4x16x8xf32>
    %233 = vector.shape_cast %232 : vector<4x16x8xf32> to vector<8x8x8xf32>
    "tpu.trace_start"() <{level = 10 : i32, message = "nqd,nkd->nqk"}> : () -> ()
    %cst_94 = arith.constant dense<0.000000e+00> : vector<8x8x8xf32>
    %234 = tpu.matmul %213, %223, %cst_94 {dimension_numbers = #tpu.dot_dimension_numbers<[2], [2], [1], [1], [0, 0, 0, 1, 1, 1], [0], [0]>} : vector<8x8x8xf32>, vector<8x8x8xf32>, vector<8x8x8xf32> -> vector<8x8x8xf32>
    "tpu.trace_stop"() : () -> ()
    %cst_95 = arith.constant 0.353553385 : f32
    %235 = vector.broadcast %cst_95 : f32 to vector<8x8x8xf32>
    %236 = arith.mulf %234, %235 : vector<8x8x8xf32>
    %237 = vector.broadcast %56 : vector<8x1x8xf32> to vector<8x8x8xf32>
    %238 = arith.addf %236, %237 : vector<8x8x8xf32>
    %cst_96 = arith.constant dense<0xFF800000> : vector<8x8xf32>
    %239 = vector.multi_reduction <maximumf>, %238, %cst_96 [2] : vector<8x8x8xf32> to vector<8x8xf32>
    %240 = vector.shape_cast %239 : vector<8x8xf32> to vector<8x8x1xf32>
    %241 = vector.broadcast %240 : vector<8x8x1xf32> to vector<8x8x8xf32>
    %242 = arith.subf %238, %241 : vector<8x8x8xf32>
    %243 = math.exp %242 : vector<8x8x8xf32>
    %cst_97 = arith.constant dense<0.000000e+00> : vector<8x8xf32>
    %244 = vector.multi_reduction <add>, %243, %cst_97 [2] : vector<8x8x8xf32> to vector<8x8xf32>
    %245 = vector.shape_cast %244 : vector<8x8xf32> to vector<8x8x1xf32>
    %246 = tpu.reciprocal %245 {approx = true} : vector<8x8x1xf32> -> vector<8x8x1xf32>
    %247 = vector.broadcast %246 : vector<8x8x1xf32> to vector<8x8x8xf32>
    %248 = arith.mulf %243, %247 : vector<8x8x8xf32>
    "tpu.trace_start"() <{level = 10 : i32, message = "nqk,nkd->nqd"}> : () -> ()
    %cst_98 = arith.constant dense<0.000000e+00> : vector<8x8x8xf32>
    %249 = tpu.matmul %248, %233, %cst_98 {dimension_numbers = #tpu.dot_dimension_numbers<[2], [1], [1], [2], [0, 0, 0, 1, 1, 2], [0], [0]>} : vector<8x8x8xf32>, vector<8x8x8xf32>, vector<8x8x8xf32> -> vector<8x8x8xf32>
    "tpu.trace_stop"() : () -> ()
    %250 = vector.shape_cast %249 : vector<8x8x8xf32> to vector<4x16x8xf32>
    %251 = vector.extract_strided_slice %250 {offsets = [0, 0, 0], sizes = [1, 16, 8], strides = [1, 1, 1]} : vector<4x16x8xf32> to vector<1x16x8xf32>
    %252 = vector.shape_cast %251 : vector<1x16x8xf32> to vector<16x8xf32>
    %253 = vector.extract_strided_slice %250 {offsets = [1, 0, 0], sizes = [1, 16, 8], strides = [1, 1, 1]} : vector<4x16x8xf32> to vector<1x16x8xf32>
    %254 = vector.shape_cast %253 : vector<1x16x8xf32> to vector<16x8xf32>
    %255 = vector.extract_strided_slice %250 {offsets = [2, 0, 0], sizes = [1, 16, 8], strides = [1, 1, 1]} : vector<4x16x8xf32> to vector<1x16x8xf32>
    %256 = vector.shape_cast %255 : vector<1x16x8xf32> to vector<16x8xf32>
    %257 = vector.extract_strided_slice %250 {offsets = [3, 0, 0], sizes = [1, 16, 8], strides = [1, 1, 1]} : vector<4x16x8xf32> to vector<1x16x8xf32>
    %258 = vector.shape_cast %257 : vector<1x16x8xf32> to vector<16x8xf32>
    %259 = tpu.concatenate %252, %254, %256, %258 in 1 : vector<16x8xf32>, vector<16x8xf32>, vector<16x8xf32>, vector<16x8xf32> -> vector<16x32xf32>
    %c1_99 = arith.constant 1 : index
    %c0_100 = arith.constant 0 : index
    %c0_101 = arith.constant 0 : index
    %260 = vector.load %arg5[%c1_99, %c0_100, %c0_101] : memref<2x33x32xf32, #tpu.memory_space<vmem>>, vector<1x33x32xf32>
    %261 = vector.shape_cast %260 : vector<1x33x32xf32> to vector<33x32xf32>
    %262 = vector.extract_strided_slice %261 {offsets = [0, 0], sizes = [32, 32], strides = [1, 1]} : vector<33x32xf32> to vector<32x32xf32>
    %cst_102 = arith.constant dense<0.000000e+00> : vector<16x32xf32>
    %263 = tpu.matmul %259, %262, %cst_102 {dimension_numbers = #tpu.dot_dimension_numbers<[1], [0], [0], [1], [0, 0, 1, 1], [], []>} : vector<16x32xf32>, vector<32x32xf32>, vector<16x32xf32> -> vector<16x32xf32>
    %264 = vector.extract_strided_slice %261 {offsets = [32, 0], sizes = [1, 32], strides = [1, 1]} : vector<33x32xf32> to vector<1x32xf32>
    %265 = vector.broadcast %264 : vector<1x32xf32> to vector<16x32xf32>
    %266 = arith.addf %263, %265 : vector<16x32xf32>
    %267 = arith.addf %196, %266 : vector<16x32xf32>
    %c4_103 = arith.constant 4 : index
    %c0_104 = arith.constant 0 : index
    %c0_105 = arith.constant 0 : index
    %268 = vector.load %arg8[%c4_103, %c0_104, %c0_105] : memref<10x1x32xf32, #tpu.memory_space<vmem>>, vector<1x1x32xf32>
    %269 = vector.shape_cast %268 : vector<1x1x32xf32> to vector<1x32xf32>
    %c5_106 = arith.constant 5 : index
    %c0_107 = arith.constant 0 : index
    %c0_108 = arith.constant 0 : index
    %270 = vector.load %arg8[%c5_106, %c0_107, %c0_108] : memref<10x1x32xf32, #tpu.memory_space<vmem>>, vector<1x1x32xf32>
    %271 = vector.shape_cast %270 : vector<1x1x32xf32> to vector<1x32xf32>
    %cst_109 = arith.constant dense<0.000000e+00> : vector<16xf32>
    %272 = vector.multi_reduction <add>, %267, %cst_109 [1] : vector<16x32xf32> to vector<16xf32>
    %273 = vector.shape_cast %272 : vector<16xf32> to vector<16x1xf32>
    %cst_110 = arith.constant 3.200000e+01 : f32
    %274 = vector.broadcast %cst_110 : f32 to vector<16x1xf32>
    %275 = arith.divf %273, %274 : vector<16x1xf32>
    %276 = vector.broadcast %275 : vector<16x1xf32> to vector<16x32xf32>
    %277 = arith.subf %267, %276 : vector<16x32xf32>
    %278 = arith.mulf %277, %277 : vector<16x32xf32>
    %cst_111 = arith.constant dense<0.000000e+00> : vector<16xf32>
    %279 = vector.multi_reduction <add>, %278, %cst_111 [1] : vector<16x32xf32> to vector<16xf32>
    %280 = vector.shape_cast %279 : vector<16xf32> to vector<16x1xf32>
    %cst_112 = arith.constant 3.200000e+01 : f32
    %281 = vector.broadcast %cst_112 : f32 to vector<16x1xf32>
    %282 = arith.divf %280, %281 : vector<16x1xf32>
    %283 = vector.broadcast %275 : vector<16x1xf32> to vector<16x32xf32>
    %284 = arith.subf %267, %283 : vector<16x32xf32>
    %cst_113 = arith.constant 9.99999974E-6 : f32
    %285 = vector.broadcast %cst_113 : f32 to vector<16x1xf32>
    %286 = arith.addf %282, %285 : vector<16x1xf32>
    %287 = math.rsqrt %286 : vector<16x1xf32>
    %288 = vector.broadcast %287 : vector<16x1xf32> to vector<16x32xf32>
    %289 = arith.mulf %284, %288 : vector<16x32xf32>
    %290 = vector.broadcast %269 : vector<1x32xf32> to vector<16x32xf32>
    %291 = arith.mulf %289, %290 : vector<16x32xf32>
    %292 = vector.broadcast %271 : vector<1x32xf32> to vector<16x32xf32>
    %293 = arith.addf %291, %292 : vector<16x32xf32>
    %c1_114 = arith.constant 1 : index
    %c0_115 = arith.constant 0 : index
    %c0_116 = arith.constant 0 : index
    %294 = vector.load %arg6[%c1_114, %c0_115, %c0_116] : memref<2x33x64xf32, #tpu.memory_space<vmem>>, vector<1x33x64xf32>
    %295 = vector.shape_cast %294 : vector<1x33x64xf32> to vector<33x64xf32>
    %c1_117 = arith.constant 1 : index
    %c0_118 = arith.constant 0 : index
    %c0_119 = arith.constant 0 : index
    %296 = vector.load %arg7[%c1_117, %c0_118, %c0_119] : memref<2x65x32xf32, #tpu.memory_space<vmem>>, vector<1x65x32xf32>
    %297 = vector.shape_cast %296 : vector<1x65x32xf32> to vector<65x32xf32>
    %298 = vector.extract_strided_slice %295 {offsets = [0, 0], sizes = [32, 64], strides = [1, 1]} : vector<33x64xf32> to vector<32x64xf32>
    %cst_120 = arith.constant dense<0.000000e+00> : vector<16x64xf32>
    %299 = tpu.matmul %293, %298, %cst_120 {dimension_numbers = #tpu.dot_dimension_numbers<[1], [0], [0], [1], [0, 0, 1, 1], [], []>} : vector<16x32xf32>, vector<32x64xf32>, vector<16x64xf32> -> vector<16x64xf32>
    %300 = vector.extract_strided_slice %295 {offsets = [32, 0], sizes = [1, 64], strides = [1, 1]} : vector<33x64xf32> to vector<1x64xf32>
    %301 = vector.broadcast %300 : vector<1x64xf32> to vector<16x64xf32>
    %302 = arith.addf %299, %301 : vector<16x64xf32>
    %cst_121 = arith.constant 0.000000e+00 : f32
    %303 = vector.broadcast %cst_121 : f32 to vector<16x64xf32>
    %304 = arith.maximumf %302, %303 : vector<16x64xf32>
    %305 = vector.extract_strided_slice %297 {offsets = [0, 0], sizes = [64, 32], strides = [1, 1]} : vector<65x32xf32> to vector<64x32xf32>
    %cst_122 = arith.constant dense<0.000000e+00> : vector<16x32xf32>
    %306 = tpu.matmul %304, %305, %cst_122 {dimension_numbers = #tpu.dot_dimension_numbers<[1], [0], [0], [1], [0, 0, 1, 1], [], []>} : vector<16x64xf32>, vector<64x32xf32>, vector<16x32xf32> -> vector<16x32xf32>
    %307 = vector.extract_strided_slice %297 {offsets = [64, 0], sizes = [1, 32], strides = [1, 1]} : vector<65x32xf32> to vector<1x32xf32>
    %308 = vector.broadcast %307 : vector<1x32xf32> to vector<16x32xf32>
    %309 = arith.addf %306, %308 : vector<16x32xf32>
    %310 = arith.addf %293, %309 : vector<16x32xf32>
    %c6_123 = arith.constant 6 : index
    %c0_124 = arith.constant 0 : index
    %c0_125 = arith.constant 0 : index
    %311 = vector.load %arg8[%c6_123, %c0_124, %c0_125] : memref<10x1x32xf32, #tpu.memory_space<vmem>>, vector<1x1x32xf32>
    %312 = vector.shape_cast %311 : vector<1x1x32xf32> to vector<1x32xf32>
    %c7_126 = arith.constant 7 : index
    %c0_127 = arith.constant 0 : index
    %c0_128 = arith.constant 0 : index
    %313 = vector.load %arg8[%c7_126, %c0_127, %c0_128] : memref<10x1x32xf32, #tpu.memory_space<vmem>>, vector<1x1x32xf32>
    %314 = vector.shape_cast %313 : vector<1x1x32xf32> to vector<1x32xf32>
    %cst_129 = arith.constant dense<0.000000e+00> : vector<16xf32>
    %315 = vector.multi_reduction <add>, %310, %cst_129 [1] : vector<16x32xf32> to vector<16xf32>
    %316 = vector.shape_cast %315 : vector<16xf32> to vector<16x1xf32>
    %cst_130 = arith.constant 3.200000e+01 : f32
    %317 = vector.broadcast %cst_130 : f32 to vector<16x1xf32>
    %318 = arith.divf %316, %317 : vector<16x1xf32>
    %319 = vector.broadcast %318 : vector<16x1xf32> to vector<16x32xf32>
    %320 = arith.subf %310, %319 : vector<16x32xf32>
    %321 = arith.mulf %320, %320 : vector<16x32xf32>
    %cst_131 = arith.constant dense<0.000000e+00> : vector<16xf32>
    %322 = vector.multi_reduction <add>, %321, %cst_131 [1] : vector<16x32xf32> to vector<16xf32>
    %323 = vector.shape_cast %322 : vector<16xf32> to vector<16x1xf32>
    %cst_132 = arith.constant 3.200000e+01 : f32
    %324 = vector.broadcast %cst_132 : f32 to vector<16x1xf32>
    %325 = arith.divf %323, %324 : vector<16x1xf32>
    %326 = vector.broadcast %318 : vector<16x1xf32> to vector<16x32xf32>
    %327 = arith.subf %310, %326 : vector<16x32xf32>
    %cst_133 = arith.constant 9.99999974E-6 : f32
    %328 = vector.broadcast %cst_133 : f32 to vector<16x1xf32>
    %329 = arith.addf %325, %328 : vector<16x1xf32>
    %330 = math.rsqrt %329 : vector<16x1xf32>
    %331 = vector.broadcast %330 : vector<16x1xf32> to vector<16x32xf32>
    %332 = arith.mulf %327, %331 : vector<16x32xf32>
    %333 = vector.broadcast %312 : vector<1x32xf32> to vector<16x32xf32>
    %334 = arith.mulf %332, %333 : vector<16x32xf32>
    %335 = vector.broadcast %314 : vector<1x32xf32> to vector<16x32xf32>
    %336 = arith.addf %334, %335 : vector<16x32xf32>
    %c8 = arith.constant 8 : index
    %c0_134 = arith.constant 0 : index
    %c0_135 = arith.constant 0 : index
    %337 = vector.load %arg8[%c8, %c0_134, %c0_135] : memref<10x1x32xf32, #tpu.memory_space<vmem>>, vector<1x1x32xf32>
    %338 = vector.shape_cast %337 : vector<1x1x32xf32> to vector<1x32xf32>
    %c9 = arith.constant 9 : index
    %c0_136 = arith.constant 0 : index
    %c0_137 = arith.constant 0 : index
    %339 = vector.load %arg8[%c9, %c0_136, %c0_137] : memref<10x1x32xf32, #tpu.memory_space<vmem>>, vector<1x1x32xf32>
    %340 = vector.shape_cast %339 : vector<1x1x32xf32> to vector<1x32xf32>
    %cst_138 = arith.constant dense<0.000000e+00> : vector<16xf32>
    %341 = vector.multi_reduction <add>, %336, %cst_138 [1] : vector<16x32xf32> to vector<16xf32>
    %342 = vector.shape_cast %341 : vector<16xf32> to vector<16x1xf32>
    %cst_139 = arith.constant 3.200000e+01 : f32
    %343 = vector.broadcast %cst_139 : f32 to vector<16x1xf32>
    %344 = arith.divf %342, %343 : vector<16x1xf32>
    %345 = vector.broadcast %344 : vector<16x1xf32> to vector<16x32xf32>
    %346 = arith.subf %336, %345 : vector<16x32xf32>
    %347 = arith.mulf %346, %346 : vector<16x32xf32>
    %cst_140 = arith.constant dense<0.000000e+00> : vector<16xf32>
    %348 = vector.multi_reduction <add>, %347, %cst_140 [1] : vector<16x32xf32> to vector<16xf32>
    %349 = vector.shape_cast %348 : vector<16xf32> to vector<16x1xf32>
    %cst_141 = arith.constant 3.200000e+01 : f32
    %350 = vector.broadcast %cst_141 : f32 to vector<16x1xf32>
    %351 = arith.divf %349, %350 : vector<16x1xf32>
    %352 = vector.broadcast %344 : vector<16x1xf32> to vector<16x32xf32>
    %353 = arith.subf %336, %352 : vector<16x32xf32>
    %cst_142 = arith.constant 9.99999974E-6 : f32
    %354 = vector.broadcast %cst_142 : f32 to vector<16x1xf32>
    %355 = arith.addf %351, %354 : vector<16x1xf32>
    %356 = math.rsqrt %355 : vector<16x1xf32>
    %357 = vector.broadcast %356 : vector<16x1xf32> to vector<16x32xf32>
    %358 = arith.mulf %353, %357 : vector<16x32xf32>
    %359 = vector.broadcast %338 : vector<1x32xf32> to vector<16x32xf32>
    %360 = arith.mulf %358, %359 : vector<16x32xf32>
    %361 = vector.broadcast %340 : vector<1x32xf32> to vector<16x32xf32>
    %362 = arith.addf %360, %361 : vector<16x32xf32>
    %c0_143 = arith.constant 0 : index
    %c0_144 = arith.constant 0 : index
    %363 = vector.load %arg9[%c0_143, %c0_144] : memref<16x32xf32, #tpu.memory_space<vmem>>, vector<16x32xf32>
    tpu.vector_store %arg9[%c0_143, %c0_144], %362 {strides = array<i32>} : memref<16x32xf32, #tpu.memory_space<vmem>>, vector<16x32xf32>,
    return
  }
}

</mosaic_0001>

<bundles_post_ra>
// kernel: transformer_encoder_forward.1
= control target key start
LH: loop header
LB: loop body
LE: loop exit
PB: predicated region body
PF: predicated region fallthrough
CT: control target
= control target key end

     0   :  { %14 = vsyncpa [#allocation4], 0  ;;  %s5434_s0 = inlined_call_operand.vmem [shape: s32[2,8], index: 0, kind: input, shape index: {}]   ;;  %s5435_s1 = inlined_call_operand.vmem [shape: f32[2,1,8], index: 1, kind: input, shape index: {}]   ;;  %s5436_s2 = inlined_call_operand.vmem [shape: f32[100,32], index: 2, kind: input, shape index: {}]   ;;  %s5437_s3 = inlined_call_operand.vmem [shape: f32[16,32], index: 3, kind: input, shape index: {}]   ;;  %s5438_s4 = inlined_call_operand.vmem [shape: f32[2,33,96], index: 4, kind: input, shape index: {}]   ;;  %s5439_s5 = inlined_call_operand.vmem [shape: f32[2,33,32], index: 5, kind: input, shape index: {}]   ;;  %s5440_s6 = inlined_call_operand.vmem [shape: f32[2,33,64], index: 6, kind: input, shape index: {}]   ;;  %s5441_s7 = inlined_call_operand.vmem [shape: f32[2,65,32], index: 7, kind: input, shape index: {}]   ;;  %s5442_s8 = inlined_call_operand.vmem [shape: f32[10,1,32], index: 8, kind: input, shape index: {}]   ;;  %s5443_s9 = inlined_call_operand.hbm [shape: f32[16,32], index: 9, kind: output, shape index: {}]  }
   0x1   :  { %15 = vsyncpa [#allocation3], 0  ;;  %s22_s11 = sshll.u32 %s5434_s0, 4  ;;  %s23_s11 = int_to_ptr.vmem [resolvable:$true] %s22_s11 }
   0x2   :  { %s4614_s12 = scalar_lea.vmem %s23_s11, 32  ;;  %p4619_p1 = scmp.lt.s32.totalorder %s23_s11, %s23_s11 }
   0x3   :  { %p4615_p0 = scmp.ne.s32.totalorder %s23_s11, %s4614_s12  ;;  %p4620_p2 = scmp.lt.s32.totalorder %s4614_s12, %s4614_s12 }
   0x5   :  { %p4621_p3 = por %p4620_p2, %p4619_p1 }
   0x7   :  { %p4622_p4 = pnand %p4621_p3, %p4615_p0 }
   0x9   :  { %4625 = shalt.err (!%p4622_p4)
}
   0xa   :  { %s4652_s13 = smov [#allocation2]  }
   0xb   :  { %25 = dma.vmem_to_smem %s23_s11, 32, %s4652_s13, [#allocation4]  }
   0xc   :  { %4648 = dma.done.wait [#allocation4], 32  }
   0xd   :  { %4649 = vsyncadd [#allocation4], 4294967264 }
   0xe   :  { %45 = sfence }
   0xf   :  { %v167_v0 = vld [vmem:[%s5438_s4] sm:$0xff]  ;;  %v168_v1 = vld [vmem:[%s5438_s4 + $0x8] sm:$0xff]  ;;  %v169_v2 = vld [vmem:[%s5438_s4 + $0x10] sm:$0xff]  ;;  %s46_s19 = sld [smem:[#allocation2]]  ;;  %s3921_s22 = sld [smem:[#allocation2 + $0x1]]  ;;  %vm136_vm0 = vcmask 1040384  }
  0x10   :  { %v4437_v3 = vpack.c.bf16 %v168_v1, %v167_v0  ;;  %v170_v4 = vld [vmem:[%s5438_s4 + $0x18] sm:$0xff]  ;;  %s3922_s23 = sld [smem:[#allocation2 + $0x2]]  ;;  %s3923_s24 = sld [smem:[#allocation2 + $0x3]]  ;;  %vm138_vm1 = vcmask 1041408   ;;  %vm140_vm2 = vcmask 1042432   ;;  %vm142_vm3 = vcmask 1043456  }
  0x11   :  { %v4441_v5 = vpack.c.bf16 %v170_v4, %v169_v2  ;;  %s3924_s25 = sld [smem:[#allocation2 + $0x4]]  ;;  %s4730_s26 = sld [smem:[#allocation2 + $0x5]]  ;;  %vm144_vm4 = vcmask 1044480   ;;  %vm146_vm5 = vcmask 1045504   ;;  %vm148_vm6 = vcmask 1046528   ;;  %v157_v34 = vld [vmem:[%s5437_s3] sm:$0xff] }
  0x12   :  { %4438 = vmatprep.subr.bf16.mxu1 %v4437_v3  ;;  %s4732_s27 = sld [smem:[#allocation2 + $0x6]]  ;;  %s4734_s28 = sld [smem:[#allocation2 + $0x7]]  ;;  %vm176_vm7 = vcmask 261120   ;;  %v158_v50 = vld [vmem:[%s5437_s3 + $0x8] sm:$0xff]  ;;  %v3938_v54 = vld [vmem:[%s5438_s4 + $0x20] ss:$0 sm:$0xff] }
  0x13   :  { %4440 = vmatpush3.bf16.msra.mxu1 %v4437_v3  ;;  %s4736_s29 = sld [smem:[#allocation2 + $0x80]]  ;;  %s4738_s30 = sld [smem:[#allocation2 + $0x81]]  ;;  %v4653_v56 = vmov 0.0   ;;  %vm4656_vm8 = vmmov 0   ;;  %vm274_vm9 = vcmask 64512   ;;  %vm1631_vm10 = vcmask 130048  }
  0x14   :  { %4442 = vmatprep.subr.bf16.mxu1 %v4441_v5  ;;  %s4740_s10 = sld [smem:[#allocation2 + $0x82]]  ;;  %s4745_s14 = sld [smem:[#allocation2 + $0x83]]  ;;  %4194 = vmatprep.subr.mxu0 %v4653_v56  ;;  %vm1634_vm11 = vcmask 195584   ;;  %vm1880_vm12 = vcmask 523264  }
  0x15   :  { %s47_s13 = scalar_lea.vmem %s5436_s2, %s46_s19  ;;  %s50_s17 = scalar_lea.vmem %s5436_s2, %s3921_s22  ;;  %4196 = vmatprep.mubr.msk.f32.mxu0 %vm4656_vm8, %v4653_v56 }
  0x16   :  { %s53_s20 = scalar_lea.vmem %s5436_s2, %s3922_s23  ;;  %v48_v6 = vld [vmem:[%s47_s13] sm:$0x1]  ;;  %s56_s11 = scalar_lea.vmem %s5436_s2, %s3923_s24 }
  0x17   :  { %4444 = vmatpush3.bf16.msra.mxu1 %v4441_v5  ;;  %v51_v7 = vld [vmem:[%s50_s17] sm:$0x1]  ;;  %s59_s15 = scalar_lea.vmem %s5436_s2, %s3924_s25  ;;  %s62_s0 = scalar_lea.vmem %s5436_s2, %s4730_s26 }
  0x18   :  { %v54_v8 = vld [vmem:[%s53_s20] sm:$0x1]  ;;  %s65_s17 = scalar_lea.vmem %s5436_s2, %s4732_s27  ;;  %v95_v11 = vrot.slane %v51_v7, 7  ;;  %s68_s25 = scalar_lea.vmem %s5436_s2, %s4734_s28  ;;  %4184 = vmatprep.subr.mxu1 %v4653_v56 }
  0x19   :  { %v57_v9 = vld [vmem:[%s56_s11] sm:$0x1]  ;;  %v98_v12 = vrot.slane %v54_v8, 6  ;;  %s71_s11 = scalar_lea.vmem %s5436_s2, %s4736_s29  ;;  %s74_s27 = scalar_lea.vmem %s5436_s2, %s4738_s30 }
  0x1a   :  { %v60_v10 = vld [vmem:[%s59_s15] sm:$0x1]  ;;  %v101_v15 = vrot.slane %v57_v9, 5  ;;  %s77_s23 = scalar_lea.vmem %s5436_s2, %s4740_s10  ;;  %v137_v21 = vsel %vm136_vm0, %v48_v6, %v95_v11  ;;  %s80_s16 = scalar_lea.vmem %s5436_s2, %s4745_s14 }
  0x1b   :  { %v63_v13 = vld [vmem:[%s62_s0] sm:$0x1]  ;;  %v104_v16 = vrot.slane %v60_v10, 4  ;;  %s3932_s0 = sld [smem:[#allocation2 + $0x84]]  ;;  %v139_v24 = vsel %vm138_vm1, %v137_v21, %v98_v12  ;;  %s3933_s18 = sld [smem:[#allocation2 + $0x85]]  ;;  %v891_v10 = vlaneseq }
  0x1c   :  { %v66_v14 = vld [vmem:[%s65_s17] sm:$0x1]  ;;  %v107_v19 = vrot.slane %v63_v13, 3  ;;  %s3934_s30 = sld [smem:[#allocation2 + $0x86]]  ;;  %v141_v26 = vsel %vm140_vm2, %v139_v24, %v101_v15  ;;  %s3935_s13 = sld [smem:[#allocation2 + $0x87]] }
  0x1d   :  { %v69_v17 = vld [vmem:[%s68_s25] sm:$0x1]  ;;  %v110_v20 = vrot.slane %v66_v14, 2  ;;  %v143_v31 = vsel %vm142_vm3, %v141_v26, %v104_v16  ;;  %s4654_s3 = smov 112   ;;  %v892_v13 = vshrl.u32 %v891_v10, 7  ;;  %s4662_s22 = smov 24  }
  0x1e   :  { %v72_v18 = vld [vmem:[%s71_s11] sm:$0x1]  ;;  %v113_v27 = vrot.slane %v69_v17, 1  ;;  %v145_v32 = vsel %vm144_vm4, %v143_v31, %v107_v19  ;;  %v162_v14 = vld [vmem:[%s5435_s1 + $0x1] sm:$0x1]  ;;  %s4663_s24 = smov [#allocation5]  }
  0x1f   :  { %v75_v22 = vld [vmem:[%s74_s27] sm:$0x1]  ;;  %v147_v35 = vsel %vm146_vm5, %v145_v32, %v110_v20  ;;  %v893_v16 = vsub.s32 0, %v892_v13  ;;  %v3937_v17 = vadd.f32 -1.0, %v162_v14  ;;  %s4661_s27 = smov 16  }
  0x20   :  { %v78_v23 = vld [vmem:[%s77_s23] sm:$0x1]  ;;  %v116_v28 = vrot.slane %v75_v22, 7  ;;  %v149_v37 = vsel %vm148_vm6, %v147_v35, %v113_v27 }
  0x21   :  { %v81_v25 = vld [vmem:[%s80_s16] sm:$0x1]  ;;  %v119_v29 = vrot.slane %v78_v23, 6  ;;  %s83_s20 = scalar_lea.vmem %s5436_s2, %s3932_s0  ;;  %s86_s21 = scalar_lea.vmem %s5436_s2, %s3933_s18  ;;  %v4809_v40 = vadd.f32 %v157_v34, %v149_v37  ;;  %v166_v19 = vmul.f32 1e+09, %v3937_v17 }
  0x22   :  { %v122_v30 = vrot.slane %v81_v25, 5  ;;  %v150_v33 = vsel %vm136_vm0, %v72_v18, %v116_v28  ;;  %v84_v38 = vld [vmem:[%s83_s20] sm:$0x1]  ;;  %s89_s12 = scalar_lea.vmem %s5436_s2, %s3934_s30  ;;  %s92_s15 = scalar_lea.vmem %s5436_s2, %s3935_s13 }
  0x23   :  { %v151_v36 = vsel %vm138_vm1, %v150_v33, %v119_v29  ;;  %v87_v41 = vld [vmem:[%s86_s21] sm:$0x1]  ;;  %v125_v43 = vrot.slane %v84_v38, 4  ;;  %4181 = vmatprep.mubr.msk.f32.mxu1 %vm176_vm7, %v4809_v40  ;;  %s4655_s16 = smov 120   ;;  %s4657_s0 = smov 104   ;;  %v4937_v24 = vrot.slane %v166_v19, %v893_v16 }
  0x24   :  { %v152_v39 = vsel %vm140_vm2, %v151_v36, %v122_v30  ;;  %v90_v42 = vld [vmem:[%s89_s12] sm:$0x1]  ;;  %v128_v45 = vrot.slane %v87_v41, 3  ;;  %s4658_s18 = smov 96   ;;  %s4660_s12 = smov 8  }
  0x25   :  { %v93_v44 = vld [vmem:[%s92_s15] sm:$0x1]  ;;  %v131_v46 = vrot.slane %v90_v42, 2  ;;  %v153_v48 = vsel %vm142_vm3, %v152_v39, %v125_v43  ;;  %s3893_s20 = sshll.u32 %s4663_s24, 4  ;;  %s3894_s20 = int_to_ptr.vmem [resolvable:$true] %s3893_s20 }
  0x26   :  { %v134_v47 = vrot.slane %v93_v44, 1  ;;  %v154_v49 = vsel %vm144_vm4, %v153_v48, %v128_v45  ;;  %v161_v11 = vld [vmem:[%s5435_s1] sm:$0x1]  ;;  %s4659_s1 = smov 64   ;;  %s4626_s25 = scalar_lea.vmem %s3894_s20, 256 }
  0x27   :  { %v155_v51 = vsel %vm146_vm5, %v154_v49, %v131_v46  ;;  %v3936_v12 = vadd.f32 -1.0, %v161_v11  ;;  %p4627_p5 = scmp.ne.s32.totalorder %s3894_s20, %s4626_s25  ;;  %p4631_p6 = scmp.lt.s32.totalorder %s3894_s20, %s3894_s20 }
  0x28   :  { %v156_v52 = vsel %vm148_vm6, %v155_v51, %v134_v47  ;;  %p4632_p7 = scmp.lt.s32.totalorder %s4626_s25, %s4626_s25 }
  0x29   :  { %v4823_v53 = vadd.f32 %v158_v50, %v156_v52  ;;  %v165_v15 = vmul.f32 1e+09, %v3936_v12 }
  0x2a   :  { %p4633_p8 = por %p4632_p7, %p4631_p6 }
  0x2b   :  { %4182 = vmatmul.mubr.msk.f32.vlgmr.msra.gmra.mrb[0].mxu1 %vm176_vm7, %v4823_v53  ;;  %v4934_v18 = vrot.slane %v165_v15, %v893_v16 }
  0x2c   :  { %4186 = vmatprep.mubr.msk.f32.mxu1 %vm4656_vm8, %v4653_v56  ;;  %p4634_p9 = pnand %p4633_p8, %p4627_p5 }
  0xfe   :  { %v4183_v55 = vpop.f32.mrb[0].mxu1 }
  0xff   :  { %v249_v57 = vpop.f32.mrb[1].mxu1  ;;  %v4842_v59 = vadd.f32 %v4183_v55, %v3938_v54 }
 0x100   :  { %v4832_v58 = vadd.f32 %v3938_v54, %v249_v57 }
 0x102   :  { %264 = vrot.lane.b32.xlu1 %v4832_v58, %s4654_s3  ;;  %260 = vrot.lane.b32.xlu0 %v4832_v58, %s4655_s16 }
 0x106   :  { %266 = vrot.lane.b32.xlu1 %v4842_v59, %s4654_s3  ;;  %262 = vrot.lane.b32.xlu0 %v4842_v59, %s4655_s16 }
 0x10a   :  { %270 = vrot.lane.b32.xlu1 %v4842_v59, %s4657_s0  ;;  %268 = vrot.lane.b32.xlu0 %v4832_v58, %s4657_s0 }
 0x10e   :  { %349 = vrot.lane.b32.xlu1 %v4842_v59, %s4658_s18  ;;  %272 = vrot.lane.b32.xlu0 %v4832_v58, %s4658_s18 }
 0x174   :  { %v4856_v60 = vpop.permute.xlu1 %264  ;;  %v4858_v61 = vpop.permute.xlu0 %260 }
 0x175   :  { %425 = vrot.lane.b32.xlu0 %v4858_v61, %s4658_s18 }
 0x178   :  { %v4862_v62 = vpop.permute.xlu1 %266  ;;  %v4864_v63 = vpop.permute.xlu0 %262 }
 0x179   :  { %577 = vrot.lane.b32.xlu0 %v4856_v60, %s4658_s18  ;;  %501 = vrot.lane.b32.xlu1 %v4864_v63, %s4658_s18 }
 0x17c   :  { %v4870_v0 = vpop.permute.xlu0 %268  ;;  %v4876_v1 = vpop.permute.xlu1 %270 }
 0x17d   :  { %653 = vrot.lane.b32.xlu1 %v4862_v62, %s4658_s18  ;;  %729 = vrot.lane.b32.xlu0 %v4870_v0, %s4658_s18 }
 0x180   :  { %v273_v2 = vpop.permute.xlu0 %272  ;;  %v350_v3 = vpop.permute.xlu1 %349 }
 0x181   :  { %805 = vrot.lane.b32.xlu1 %v4876_v1, %s4658_s18  ;;  %4185 = vmatpush3.xpose.msk.msra.mxu1 %vm274_vm9, %v273_v2 }
 0x182   :  { %4189 = vmatprep.subr.mxu1 %v4653_v56 }
 0x184   :  { %4187 = vmatmul.mubr.msk.f32.vlgmr.msra.gmra.mrb[2].mxu1 %vm274_vm9, %v4832_v58 }
 0x185   :  { %4190 = vmatpush3.xpose.msk.msra.mxu1 %vm274_vm9, %v350_v3  ;;  %4191 = vmatprep.mubr.msk.f32.mxu1 %vm4656_vm8, %v4653_v56 }
 0x186   :  { %4199 = vmatprep.subr.mxu1 %v4653_v56 }
 0x188   :  { %4192 = vmatmul.mubr.msk.f32.vlgmr.msra.gmra.mrb[4].mxu1 %vm274_vm9, %v4842_v59 }
 0x189   :  { %4201 = vmatprep.mubr.msk.f32.mxu1 %vm4656_vm8, %v4653_v56 }
 0x1e7   :  { %v426_v4 = vpop.permute.xlu0 %425 }
 0x1e8   :  { %4195 = vmatpush3.xpose.msk.msra.mxu0 %vm274_vm9, %v426_v4 }
 0x1e9   :  { %4204 = vmatprep.subr.mxu0 %v4653_v56 }
 0x1eb   :  { %v502_v5 = vpop.permute.xlu1 %501  ;;  %4197 = vmatmul.mubr.msk.f32.vlgmr.msra.gmra.mrb[0].mxu0 %vm274_vm9, %v4858_v61  ;;  %v578_v6 = vpop.permute.xlu0 %577 }
 0x1ec   :  { %4200 = vmatpush3.xpose.msk.msra.mxu1 %vm274_vm9, %v502_v5  ;;  %4205 = vmatpush3.xpose.msk.msra.mxu0 %vm274_vm9, %v578_v6 }
 0x1ed   :  { %4206 = vmatprep.mubr.msk.f32.mxu0 %vm4656_vm8, %v4653_v56  ;;  %4209 = vmatprep.subr.mxu1 %v4653_v56 }
 0x1ee   :  { %4214 = vmatprep.subr.mxu0 %v4653_v56 }
 0x1ef   :  { %v654_v7 = vpop.permute.xlu1 %653  ;;  %4202 = vmatmul.mubr.msk.f32.vlgmr.msra.gmra.mrb[6].mxu1 %vm274_vm9, %v4864_v63  ;;  %4207 = vmatmul.mubr.msk.f32.vlgmr.msra.gmra.mrb[2].mxu0 %vm274_vm9, %v4856_v60  ;;  %v730_v8 = vpop.permute.xlu0 %729 }
 0x1f0   :  { %4210 = vmatpush3.xpose.msk.msra.mxu1 %vm274_vm9, %v654_v7  ;;  %4215 = vmatpush3.xpose.msk.msra.mxu0 %vm274_vm9, %v730_v8 }
 0x1f1   :  { %4211 = vmatprep.mubr.msk.f32.mxu1 %vm4656_vm8, %v4653_v56  ;;  %4216 = vmatprep.mubr.msk.f32.mxu0 %vm4656_vm8, %v4653_v56 }
 0x1f2   :  { %4219 = vmatprep.subr.mxu1 %v4653_v56  ;;  %4224 = vmatprep.subr.mxu0 %v4653_v56 }
 0x1f3   :  { %v806_v9 = vpop.permute.xlu1 %805  ;;  %4212 = vmatmul.mubr.msk.f32.vlgmr.msra.gmra.mrb[8].mxu1 %vm274_vm9, %v4862_v62  ;;  %4217 = vmatmul.mubr.msk.f32.vlgmr.msra.gmra.mrb[4].mxu0 %vm274_vm9, %v4870_v0 }
 0x1f4   :  { %4220 = vmatpush3.xpose.msk.msra.mxu1 %vm274_vm9, %v806_v9  ;;  %4221 = vmatprep.mubr.msk.f32.mxu1 %vm4656_vm8, %v4653_v56 }
 0x1f5   :  { %4229 = vmatprep.subr.mxu1 %v4653_v56  ;;  %4226 = vmatprep.mubr.msk.f32.mxu0 %vm4656_vm8, %v4653_v56 }
 0x1f7   :  { %4222 = vmatmul.mubr.msk.f32.vlgmr.msra.gmra.mrb[10].mxu1 %vm274_vm9, %v4876_v1 }
 0x1f8   :  { %4231 = vmatprep.mubr.msk.f32.mxu1 %vm4656_vm8, %v4653_v56 }
 0x257   :  { %v345_v20 = vpop.f32.mrb[2].mxu1 }
 0x258   :  { %v881_v21 = vmul.f32 0.35355338, %v345_v20  ;;  %v4188_v22 = vpop.f32.mrb[3].mxu1 }
 0x25a   :  { %v901_v23 = vadd.f32 %v4934_v18, %v881_v21 }
 0x25b   :  { %v421_v25 = vpop.f32.mrb[4].mxu1 }
 0x25c   :  { %v882_v26 = vmul.f32 0.35355338, %v421_v25  ;;  %v4193_v27 = vpop.f32.mrb[5].mxu1  ;;  %v909_v28 = vsel %vm274_vm9, %v901_v23, -inf }
 0x25d   :  { %910 = vmax.xlane.f32.xlu0 %v909_v28 }
 0x25e   :  { %v902_v29 = vadd.f32 %v4937_v24, %v882_v26 }
 0x260   :  { %v912_v30 = vsel %vm274_vm9, %v902_v29, -inf }
 0x261   :  { %913 = vmax.xlane.f32.xlu1 %v912_v30 }
 0x2be   :  { %v497_v31 = vpop.f32.mrb[0].mxu0 }
 0x2bf   :  { %v883_v32 = vmul.f32 0.35355338, %v497_v31  ;;  %v4198_v33 = vpop.f32.mrb[1].mxu0 }
 0x2c1   :  { %v903_v34 = vadd.f32 %v4934_v18, %v883_v32 }
 0x2c2   :  { %v573_v35 = vpop.f32.mrb[6].mxu1  ;;  %v649_v36 = vpop.f32.mrb[2].mxu0 }
 0x2c3   :  { %v884_v37 = vmul.f32 0.35355338, %v573_v35  ;;  %v885_v38 = vmul.f32 0.35355338, %v649_v36  ;;  %v4203_v39 = vpop.f32.mrb[7].mxu1  ;;  %v4208_v41 = vpop.f32.mrb[3].mxu0 }
 0x2c4   :  { %v915_v42 = vsel %vm274_vm9, %v903_v34, -inf }
 0x2c5   :  { %916 = vmax.xlane.f32.xlu0 %v915_v42  ;;  %v904_v43 = vadd.f32 %v4937_v24, %v884_v37  ;;  %v905_v44 = vadd.f32 %v4934_v18, %v885_v38 }
 0x2c6   :  { %v725_v45 = vpop.f32.mrb[8].mxu1  ;;  %v801_v46 = vpop.f32.mrb[4].mxu0 }
 0x2c7   :  { %v886_v47 = vmul.f32 0.35355338, %v725_v45  ;;  %v887_v48 = vmul.f32 0.35355338, %v801_v46  ;;  %v4213_v49 = vpop.f32.mrb[9].mxu1  ;;  %v4218_v50 = vpop.f32.mrb[5].mxu0 }
 0x2c8   :  { %v918_v51 = vsel %vm274_vm9, %v904_v43, -inf  ;;  %v921_v52 = vsel %vm274_vm9, %v905_v44, -inf }
 0x2c9   :  { %919 = vmax.xlane.f32.xlu0 %v918_v51  ;;  %922 = vmax.xlane.f32.xlu1 %v921_v52  ;;  %v906_v54 = vadd.f32 %v4937_v24, %v886_v47  ;;  %v907_v55 = vadd.f32 %v4934_v18, %v887_v48 }
 0x2ca   :  { %v877_v57 = vpop.f32.mrb[10].mxu1 }
 0x2cb   :  { %v888_v2 = vmul.f32 0.35355338, %v877_v57  ;;  %v4223_v3 = vpop.f32.mrb[11].mxu1  ;;  %v924_v4 = vsel %vm274_vm9, %v906_v54, -inf  ;;  %v927_v5 = vsel %vm274_vm9, %v907_v55, -inf }
 0x2cd   :  { %925 = vmax.xlane.f32.xlu0 %v924_v4  ;;  %928 = vmax.xlane.f32.xlu1 %v927_v5  ;;  %v908_v6 = vadd.f32 %v4937_v24, %v888_v2 }
 0x2cf   :  { %v930_v7 = vsel %vm274_vm9, %v908_v6, -inf }
 0x2d1   :  { %931 = vmax.xlane.f32.xlu0 %v930_v7 }
 0x2de   :  { %997 = vrot.lane.b32.xlu1 %v4832_v58, %s4659_s1 }
 0x2e2   :  { %1149 = vrot.lane.b32.xlu1 %v4858_v61, %s4659_s1 }
 0x2e6   :  { %1225 = vrot.lane.b32.xlu1 %v4864_v63, %s4659_s1 }
 0x2e7   :  { %1073 = vrot.lane.b32.xlu0 %v4842_v59, %s4659_s1 }
 0x2ea   :  { %1377 = vrot.lane.b32.xlu1 %v4862_v62, %s4659_s1  ;;  %v911_v10 = vpop.xlane.xlu0 %910 }
 0x2eb   :  { %1301 = vrot.lane.b32.xlu0 %v4856_v60, %s4659_s1  ;;  %v933_v11 = vsub.f32 %v901_v23, %v911_v10 }
 0x2ed   :  { %v941_v12 = vmul.f32 1.442695, %v933_v11 }
 0x2ee   :  { %v914_v8 = vpop.xlane.xlu1 %913 }
 0x2ef   :  { %v934_v9 = vsub.f32 %v902_v29, %v914_v8 }
 0x2f1   :  { %v943_v58 = vmul.f32 1.442695, %v934_v9 }
 0x2f3   :  { %4530 = vpow2.f32 %v943_v58 }
 0x2f4   :  { %4532 = vpow2.f32 %v941_v12 }
 0x2fd   :  { %v4966_v61 = vpop.eup %4530 }
 0x2fe   :  { %v960_v63 = vsel %vm274_vm9, %v4966_v61, 0.0  ;;  %v4970_v59 = vpop.eup %4532 }
 0x2ff   :  { %v957_v62 = vsel %vm274_vm9, %v4970_v59, 0.0 }
 0x30a   :  { %961 = vadd.xlane.f32.xlu0 %v960_v63 }
 0x30e   :  { %958 = vadd.xlane.f32.xlu1 %v957_v62 }
 0x352   :  { %v917_v60 = vpop.xlane.xlu0 %916 }
 0x353   :  { %v935_v13 = vsub.f32 %v903_v34, %v917_v60 }
 0x355   :  { %v945_v14 = vmul.f32 1.442695, %v935_v13 }
 0x356   :  { %v923_v15 = vpop.xlane.xlu1 %922  ;;  %v920_v16 = vpop.xlane.xlu0 %919 }
 0x357   :  { %4534 = vpow2.f32 %v945_v14  ;;  %v937_v17 = vsub.f32 %v905_v44, %v923_v15  ;;  %v936_v19 = vsub.f32 %v904_v43, %v920_v16 }
 0x359   :  { %v949_v20 = vmul.f32 1.442695, %v937_v17  ;;  %v947_v21 = vmul.f32 1.442695, %v936_v19 }
 0x35a   :  { %v929_v22 = vpop.xlane.xlu1 %928  ;;  %v926_v23 = vpop.xlane.xlu0 %925 }
 0x35b   :  { %4536 = vpow2.f32 %v949_v20  ;;  %v939_v25 = vsub.f32 %v907_v55, %v929_v22  ;;  %v938_v26 = vsub.f32 %v906_v54, %v926_v23  ;;  %v1637_v20 = vld [vmem:[%s5439_s5] sm:$0xff]  ;;  %v1639_v23 = vld [vmem:[%s5439_s5 + $0x10] sm:$0xff] }
 0x35c   :  { %4538 = vpow2.f32 %v947_v21  ;;  %v1638_v21 = vld [vmem:[%s5439_s5 + $0x8] sm:$0xff] }
 0x35d   :  { %v953_v27 = vmul.f32 1.442695, %v939_v25  ;;  %v951_v28 = vmul.f32 1.442695, %v938_v26  ;;  %v4445_v22 = vpack.c.bf16 %v1638_v21, %v1637_v20  ;;  %v1640_v25 = vld [vmem:[%s5439_s5 + $0x18] sm:$0xff]  ;;  %v1784_v20 = vld [vmem:[%s5441_s7 + $0x20] sm:$0xff] }
 0x35e   :  { %v998_v29 = vpop.permute.xlu1 %997  ;;  %v932_v30 = vpop.xlane.xlu0 %931  ;;  %v4449_v26 = vpack.c.bf16 %v1640_v25, %v1639_v23  ;;  %v1785_v21 = vld [vmem:[%s5441_s7 + $0x28] sm:$0xff] }
 0x35f   :  { %4540 = vpow2.f32 %v953_v27  ;;  %v940_v31 = vsub.f32 %v908_v6, %v932_v30  ;;  %4225 = vmatpush3.msra.mxu0 %v998_v29 }
 0x360   :  { %4542 = vpow2.f32 %v951_v28  ;;  %4234 = vmatprep.subr.mxu0 %v4653_v56 }
 0x361   :  { %v4535_v32 = vpop.eup %4534  ;;  %v955_v33 = vmul.f32 1.442695, %v940_v31 }
 0x362   :  { %v1074_v34 = vpop.permute.xlu0 %1073  ;;  %v963_v35 = vsel %vm274_vm9, %v4535_v32, 0.0  ;;  %v1150_v47 = vpop.permute.xlu1 %1149 }
 0x363   :  { %4544 = vpow2.f32 %v955_v33  ;;  %964 = vadd.xlane.f32.xlu1 %v963_v35  ;;  %4230 = vmatpush3.msra.mxu1 %v1074_v34 }
 0x364   :  { %4239 = vmatprep.subr.mxu1 %v4653_v56 }
 0x365   :  { %v4537_v36 = vpop.eup %4536 }
 0x366   :  { %v4539_v37 = vpop.eup %4538  ;;  %v969_v38 = vsel %vm274_vm9, %v4537_v36, 0.0  ;;  %v1226_v48 = vpop.permute.xlu1 %1225 }
 0x367   :  { %970 = vadd.xlane.f32.xlu1 %v969_v38  ;;  %v966_v39 = vsel %vm274_vm9, %v4539_v37, 0.0  ;;  %v1302_v49 = vpop.permute.xlu0 %1301 }
 0x368   :  { %967 = vadd.xlane.f32.xlu0 %v966_v39 }
 0x369   :  { %v4541_v41 = vpop.eup %4540 }
 0x36a   :  { %v4543_v42 = vpop.eup %4542  ;;  %v975_v43 = vsel %vm274_vm9, %v4541_v41, 0.0  ;;  %v1378_v50 = vpop.permute.xlu1 %1377 }
 0x36b   :  { %976 = vadd.xlane.f32.xlu1 %v975_v43  ;;  %v972_v44 = vsel %vm274_vm9, %v4543_v42, 0.0 }
 0x36c   :  { %973 = vadd.xlane.f32.xlu0 %v972_v44 }
 0x36d   :  { %v4981_v45 = vpop.eup %4544 }
 0x36e   :  { %v978_v46 = vsel %vm274_vm9, %v4981_v45, 0.0 }
 0x370   :  { %979 = vadd.xlane.f32.xlu0 %v978_v46 }
 0x37c   :  { %1529 = vrot.lane.b32.xlu1 %v4876_v1, %s4659_s1 }
 0x386   :  { %1453 = vrot.lane.b32.xlu0 %v4870_v0, %s4659_s1 }
 0x397   :  { %v962_v51 = vpop.xlane.xlu0 %961 }
 0x398   :  { %4546 = vrcp.f32 %v962_v51 }
 0x39b   :  { %v959_v52 = vpop.xlane.xlu1 %958 }
 0x39c   :  { %4548 = vrcp.f32 %v959_v52  ;;  %v3965_v52 = vld [vmem:[%s5439_s5 + $0x20] ss:$0 sm:$0xff] }
 0x3a2   :  { %v4547_v54 = vpop.eup %4546 }
 0x3a3   :  { %v990_v55 = vmul.f32 %v4547_v54, %v4966_v61 }
 0x3a5   :  { %4232 = vmatmul.mubr.msk.f32.vlgmr.msra.gmra.mrb[12].mxu1 %vm274_vm9, %v990_v55 }
 0x3a6   :  { %v4549_v57 = vpop.eup %4548  ;;  %4240 = vmatpush3.msra.mxu1 %v1226_v48  ;;  %4241 = vmatprep.mubr.msk.f32.mxu1 %vm4656_vm8, %v4653_v56 }
 0x3a7   :  { %v989_v0 = vmul.f32 %v4549_v57, %v4970_v59  ;;  %4249 = vmatprep.subr.mxu1 %v4653_v56 }
 0x3a9   :  { %4227 = vmatmul.mubr.msk.f32.vlgmr.msra.gmra.mrb[6].mxu0 %vm274_vm9, %v989_v0 }
 0x3aa   :  { %4235 = vmatpush3.msra.mxu0 %v1150_v47  ;;  %4236 = vmatprep.mubr.msk.f32.mxu0 %vm4656_vm8, %v4653_v56 }
 0x3ab   :  { %4244 = vmatprep.subr.mxu0 %v4653_v56 }
 0x3f0   :  { %v965_v1 = vpop.xlane.xlu1 %964 }
 0x3f1   :  { %4550 = vrcp.f32 %v965_v1 }
 0x3f4   :  { %v971_v2 = vpop.xlane.xlu1 %970 }
 0x3f5   :  { %4552 = vrcp.f32 %v971_v2  ;;  %v968_v3 = vpop.xlane.xlu0 %967 }
 0x3f6   :  { %4554 = vrcp.f32 %v968_v3 }
 0x3f8   :  { %v977_v4 = vpop.xlane.xlu1 %976 }
 0x3f9   :  { %4556 = vrcp.f32 %v977_v4  ;;  %v974_v5 = vpop.xlane.xlu0 %973 }
 0x3fa   :  { %4558 = vrcp.f32 %v974_v5 }
 0x3fb   :  { %v4551_v6 = vpop.eup %4550 }
 0x3fc   :  { %v991_v7 = vmul.f32 %v4551_v6, %v4535_v32  ;;  %v1530_v60 = vpop.permute.xlu1 %1529 }
 0x3fd   :  { %v980_v8 = vpop.xlane.xlu0 %979 }
 0x3fe   :  { %4560 = vrcp.f32 %v980_v8  ;;  %4237 = vmatmul.mubr.msk.f32.vlgmr.msra.gmra.mrb[8].mxu0 %vm274_vm9, %v991_v7 }
 0x3ff   :  { %v4553_v9 = vpop.eup %4552  ;;  %4245 = vmatpush3.msra.mxu0 %v1302_v49  ;;  %4246 = vmatprep.mubr.msk.f32.mxu0 %vm4656_vm8, %v4653_v56 }
 0x400   :  { %v4555_v10 = vpop.eup %4554  ;;  %v993_v11 = vmul.f32 %v4553_v9, %v4537_v36  ;;  %4254 = vmatprep.subr.mxu0 %v4653_v56 }
 0x401   :  { %v992_v58 = vmul.f32 %v4555_v10, %v4539_v37  ;;  %v1454_v12 = vpop.permute.xlu0 %1453 }
 0x402   :  { %4247 = vmatmul.mubr.msk.f32.vlgmr.msra.gmra.mrb[10].mxu0 %vm274_vm9, %v993_v11 }
 0x403   :  { %v4557_v61 = vpop.eup %4556  ;;  %4242 = vmatmul.mubr.msk.f32.vlgmr.msra.gmra.mrb[14].mxu1 %vm274_vm9, %v992_v58  ;;  %4255 = vmatpush3.msra.mxu0 %v1454_v12 }
 0x404   :  { %v4559_v63 = vpop.eup %4558  ;;  %v995_v59 = vmul.f32 %v4557_v61, %v4541_v41  ;;  %4250 = vmatpush3.msra.mxu1 %v1378_v50  ;;  %4251 = vmatprep.mubr.msk.f32.mxu1 %vm4656_vm8, %v4653_v56  ;;  %v1776_v61 = vld [vmem:[%s5440_s6 + $0x8] sm:$0xff] }
 0x405   :  { %v994_v62 = vmul.f32 %v4559_v63, %v4543_v42  ;;  %4256 = vmatprep.mubr.msk.f32.mxu0 %vm4656_vm8, %v4653_v56  ;;  %4259 = vmatprep.subr.mxu1 %v4653_v56 }
 0x406   :  { %4257 = vmatmul.mubr.msk.f32.vlgmr.msra.gmra.mrb[12].mxu0 %vm274_vm9, %v995_v59  ;;  %4446 = vmatprep.subr.bf16.mxu0 %v4445_v22  ;;  %v1777_v59 = vld [vmem:[%s5440_s6 + $0x10] sm:$0xff] }
 0x407   :  { %4252 = vmatmul.mubr.msk.f32.vlgmr.msra.gmra.mrb[16].mxu1 %vm274_vm9, %v994_v62  ;;  %4448 = vmatpush3.bf16.msra.mxu0 %v4445_v22  ;;  %v1778_v62 = vld [vmem:[%s5440_s6 + $0x18] sm:$0xff]  ;;  %v4469_v22 = vpack.c.bf16 %v1785_v21, %v1784_v20  ;;  %v3979_v20 = vld [vmem:[%s5442_s8 + $0x2] ss:$0 sm:$0xff] }
 0x408   :  { %v4561_v13 = vpop.eup %4560  ;;  %4260 = vmatpush3.msra.mxu1 %v1530_v60  ;;  %4261 = vmatprep.mubr.msk.f32.mxu1 %vm4656_vm8, %v4653_v56  ;;  %v4457_v60 = vpack.c.bf16 %v1778_v62, %v1777_v59  ;;  %v3984_v59 = vld [vmem:[%s5438_s4 + $0x40] sm:$0xff] }
 0x409   :  { %v996_v14 = vmul.f32 %v4561_v13, %v4981_v45  ;;  %4450 = vmatprep.subr.bf16.mxu0 %v4449_v26  ;;  %v1780_v13 = vld [vmem:[%s5441_s7] sm:$0xff] }
 0x40b   :  { %4262 = vmatmul.mubr.msk.f32.vlgmr.msra.gmra.mrb[18].mxu1 %vm274_vm9, %v996_v14  ;;  %4452 = vmatpush3.bf16.msra.mxu0 %v4449_v26  ;;  %v1781_v14 = vld [vmem:[%s5441_s7 + $0x8] sm:$0xff] }
 0x478   :  { %v1145_v15 = vpop.f32.mrb[12].mxu1 }
 0x479   :  { %v4233_v16 = vpop.f32.mrb[13].mxu1 }
 0x47a   :  { %v4461_v16 = vpack.c.bf16 %v1781_v14, %v1780_v13 }
 0x47c   :  { %v1069_v17 = vpop.f32.mrb[6].mxu0  ;;  %4462 = vmatprep.subr.bf16.mxu0 %v4461_v16 }
 0x47d   :  { %v4228_v19 = vpop.f32.mrb[7].mxu0 }
 0x4d1   :  { %v1221_v27 = vpop.f32.mrb[8].mxu0 }
 0x4d2   :  { %v4238_v28 = vpop.f32.mrb[9].mxu0  ;;  %1607 = vrot.lane.b32.xlu0 %v1221_v27, %s4660_s12 }
 0x4d5   :  { %v1373_v29 = vpop.f32.mrb[10].mxu0 }
 0x4d6   :  { %v1297_v30 = vpop.f32.mrb[14].mxu1  ;;  %1615 = vrot.lane.b32.xlu0 %v1373_v29, %s4661_s27  ;;  %v4248_v31 = vpop.f32.mrb[11].mxu0 }
 0x4d7   :  { %1609 = vrot.lane.b32.xlu1 %v1297_v30, %s4660_s12  ;;  %v4243_v32 = vpop.f32.mrb[15].mxu1  ;;  %v3969_v31 = vld [vmem:[%s5442_s8] ss:$0 sm:$0xff] }
 0x4d9   :  { %v1525_v33 = vpop.f32.mrb[12].mxu0 }
 0x4da   :  { %v1449_v34 = vpop.f32.mrb[16].mxu1  ;;  %1623 = vrot.lane.b32.xlu0 %v1525_v33, %s4662_s22  ;;  %v4258_v35 = vpop.f32.mrb[13].mxu0  ;;  %v3970_v33 = vld [vmem:[%s5442_s8 + $0x1] ss:$0 sm:$0xff] }
 0x4db   :  { %1617 = vrot.lane.b32.xlu1 %v1449_v34, %s4661_s27  ;;  %v4253_v36 = vpop.f32.mrb[17].mxu1 }
 0x4de   :  { %v1601_v37 = vpop.f32.mrb[18].mxu1 }
 0x4df   :  { %1625 = vrot.lane.b32.xlu1 %v1601_v37, %s4662_s22  ;;  %v4263_v38 = vpop.f32.mrb[19].mxu1 }
 0x544   :  { %v1608_v39 = vpop.permute.xlu0 %1607 }
 0x545   :  { %v1629_v43 = vsel %vm274_vm9, %v1069_v17, %v1608_v39  ;;  %v1783_v17 = vld [vmem:[%s5441_s7 + $0x18] sm:$0xff] }
 0x548   :  { %v1616_v41 = vpop.permute.xlu0 %1615 }
 0x549   :  { %v1610_v42 = vpop.permute.xlu1 %1609  ;;  %v1632_v44 = vsel %vm1631_vm10, %v1629_v43, %v1616_v41  ;;  %v1786_v41 = vld [vmem:[%s5441_s7 + $0x30] sm:$0xff] }
 0x54a   :  { %v1630_v48 = vsel %vm274_vm9, %v1145_v15, %v1610_v42  ;;  %v1782_v15 = vld [vmem:[%s5441_s7 + $0x10] sm:$0xff]  ;;  %v1787_v42 = vld [vmem:[%s5441_s7 + $0x38] sm:$0xff] }
 0x54b   :  { %v4465_v19 = vpack.c.bf16 %v1783_v17, %v1782_v15  ;;  %v4473_v43 = vpack.c.bf16 %v1787_v42, %v1786_v41 }
 0x54c   :  { %v1624_v45 = vpop.permute.xlu0 %1623 }
 0x54d   :  { %v1618_v46 = vpop.permute.xlu1 %1617  ;;  %v1635_v47 = vsel %vm1634_vm11, %v1632_v44, %v1624_v45  ;;  %v3971_v44 = vld [vmem:[%s5440_s6 + $0x20] ss:$0 sm:$0xff] }
 0x54e   :  { %4272 = vmatprep.mubr.msk.f32.mxu0 %vm176_vm7, %v1635_v47  ;;  %v1633_v49 = vsel %vm1631_vm10, %v1630_v48, %v1618_v46 }
 0x551   :  { %v1626_v50 = vpop.permute.xlu1 %1625 }
 0x552   :  { %v1636_v51 = vsel %vm1634_vm11, %v1633_v49, %v1626_v50 }
 0x553   :  { %4273 = vmatmul.mubr.msk.f32.vlgmr.msra.gmra.mrb[14].mxu0 %vm176_vm7, %v1636_v51  ;;  %v3974_v51 = vld [vmem:[%s5441_s7 + $0x40] ss:$0 sm:$0xff] }
 0x554   :  { %4464 = vmatpush3.bf16.msra.mxu0 %v4461_v16 }
 0x555   :  { %4466 = vmatprep.subr.bf16.mxu0 %v4465_v19 }
 0x558   :  { %4468 = vmatpush3.bf16.msra.mxu0 %v4465_v19 }
 0x559   :  { %4470 = vmatprep.subr.bf16.mxu0 %v4469_v22 }
 0x55c   :  { %4472 = vmatpush3.bf16.msra.mxu0 %v4469_v22 }
 0x55d   :  { %4474 = vmatprep.subr.bf16.mxu0 %v4473_v43 }
 0x560   :  { %4476 = vmatpush3.bf16.msra.mxu0 %v4473_v43 }
 0x561   :  { %4326 = vmatprep.subr.mxu0 %v4653_v56 }
 0x626   :  { %v4274_v54 = vpop.f32.mrb[14].mxu0 }
 0x627   :  { %v1724_v55 = vadd.f32 %v4274_v54, %v3965_v52  ;;  %v1718_v57 = vpop.f32.mrb[15].mxu0 }
 0x628   :  { %v1719_v0 = vadd.f32 %v3965_v52, %v1718_v57 }
 0x629   :  { %v1728_v1 = vadd.f32 %v1724_v55, %v4823_v53 }
 0x62a   :  { %v1727_v2 = vadd.f32 %v1719_v0, %v4809_v40  ;;  %v1775_v40 = vld [vmem:[%s5440_s6] sm:$0xff] }
 0x62b   :  { %v1735_v3 = vsel %vm176_vm7, %v1728_v1, 0.0  ;;  %v4453_v63 = vpack.c.bf16 %v1776_v61, %v1775_v40  ;;  %v3982_v40 = vld [vmem:[%s5438_s4 + $0x30] sm:$0xff] }
 0x62c   :  { %1736 = vadd.xlane.f32.xlu1 %v1735_v3  ;;  %v1732_v4 = vsel %vm176_vm7, %v1727_v2, 0.0 }
 0x62d   :  { %1733 = vadd.xlane.f32.xlu0 %v1732_v4  ;;  %4454 = vmatprep.subr.bf16.mxu1 %v4453_v63 }
 0x62e   :  { %4456 = vmatpush3.bf16.msra.mxu1 %v4453_v63  ;;  %v3983_v63 = vld [vmem:[%s5438_s4 + $0x38] sm:$0xff] }
 0x62f   :  { %4458 = vmatprep.subr.bf16.mxu1 %v4457_v60  ;;  %v4481_v62 = vpack.c.bf16 %v3984_v59, %v3983_v63 }
 0x632   :  { %4460 = vmatpush3.bf16.msra.mxu1 %v4457_v60 }
 0x6b9   :  { %v1737_v5 = vpop.xlane.xlu1 %1736 }
 0x6ba   :  { %v1740_v6 = vmul.f32 0.03125, %v1737_v5  ;;  %v1734_v7 = vpop.xlane.xlu0 %1733 }
 0x6bb   :  { %v1739_v8 = vmul.f32 0.03125, %v1734_v7 }
 0x6bc   :  { %v1742_v9 = vsub.f32 %v1728_v1, %v1740_v6 }
 0x6bd   :  { %v1741_v10 = vsub.f32 %v1727_v2, %v1739_v8 }
 0x6be   :  { %v1744_v12 = vmul.f32 %v1742_v9, %v1742_v9 }
 0x6bf   :  { %v1743_v11 = vmul.f32 %v1741_v10, %v1741_v10 }
 0x6c0   :  { %v1748_v53 = vsel %vm176_vm7, %v1744_v12, 0.0 }
 0x6c1   :  { %v1745_v58 = vsel %vm176_vm7, %v1743_v11, 0.0 }
 0x6c2   :  { %1746 = vadd.xlane.f32.xlu0 %v1745_v58 }
 0x6c6   :  { %1749 = vadd.xlane.f32.xlu0 %v1748_v53  ;;  %v3981_v53 = vld [vmem:[%s5438_s4 + $0x28] sm:$0xff] }
 0x6c7   :  { %v4477_v61 = vpack.c.bf16 %v3982_v40, %v3981_v53 }
 0x6c9   :  { %4478 = vmatprep.subr.bf16.mxu1 %v4477_v61 }
 0x74f   :  { %v1747_v23 = vpop.xlane.xlu0 %1746 }
 0x750   :  { %v1751_v25 = vmul.f32 0.03125, %v1747_v23 }
 0x752   :  { %v1753_v26 = vadd.f32 1e-05, %v1751_v25  ;;  %v3980_v25 = vld [vmem:[%s5442_s8 + $0x3] ss:$0 sm:$0xff] }
 0x753   :  { %v1750_v27 = vpop.xlane.xlu0 %1749 }
 0x754   :  { %4562 = vrsqrt.f32 %v1753_v26  ;;  %v1752_v28 = vmul.f32 0.03125, %v1750_v27 }
 0x756   :  { %v1754_v29 = vadd.f32 1e-05, %v1752_v28 }
 0x758   :  { %4564 = vrsqrt.f32 %v1754_v29 }
 0x75e   :  { %v4563_v30 = vpop.eup %4562 }
 0x75f   :  { %v1757_v32 = vmul.f32 %v4563_v30, %v1741_v10  ;;  %v3986_v30 = vld [vmem:[%s5438_s4 + $0x48] ss:$0 sm:$0xff] }
 0x761   :  { %v1765_v34 = vmul.f32 %v3969_v31, %v1757_v32 }
 0x762   :  { %v4565_v35 = vpop.eup %4564 }
 0x763   :  { %v1758_v36 = vmul.f32 %v4565_v35, %v1742_v9  ;;  %v1773_v37 = vadd.f32 %v3970_v33, %v1765_v34 }
 0x765   :  { %v1766_v38 = vmul.f32 %v3969_v31, %v1758_v36  ;;  %4283 = vmatprep.mubr.msk.f32.mxu1 %vm176_vm7, %v1773_v37 }
 0x767   :  { %v1774_v39 = vadd.f32 %v3970_v33, %v1766_v38 }
 0x769   :  { %4284 = vmatmul.mubr.msk.f32.vlgmr.msra.gmra.mrb[20].mxu1 %vm176_vm7, %v1774_v39 }
 0x76a   :  { %4480 = vmatpush3.bf16.msra.mxu1 %v4477_v61 }
 0x76b   :  { %4482 = vmatprep.subr.bf16.mxu1 %v4481_v62 }
 0x76e   :  { %4484 = vmatpush3.bf16.msra.mxu1 %v4481_v62 }
 0x76f   :  { %4316 = vmatprep.subr.mxu1 %v4653_v56 }
 0x83c   :  { %v4285_v45 = vpop.f32.mrb[20].mxu1 }
 0x83d   :  { %v1871_v46 = vadd.f32 %v4285_v45, %v3971_v44  ;;  %v1865_v47 = vpop.f32.mrb[21].mxu1 }
 0x83e   :  { %v1866_v48 = vadd.f32 %v3971_v44, %v1865_v47 }
 0x83f   :  { %v1875_v50 = vmax.f32 %v1871_v46, 0.0 }
 0x840   :  { %v1874_v49 = vmax.f32 %v1866_v48, 0.0 }
 0x842   :  { %4302 = vmatprep.mubr.msk.f32.mxu0 %vm1880_vm12, %v1874_v49 }
 0x843   :  { %4303 = vmatmul.mubr.msk.f32.vlgmr.msra.gmra.mrb[16].mxu0 %vm1880_vm12, %v1875_v50 }
 0x844   :  { %4328 = vmatprep.mubr.msk.f32.mxu0 %vm4656_vm8, %v4653_v56 }
 0x916   :  { %v4304_v52 = vpop.f32.mrb[16].mxu0 }
 0x917   :  { %v1959_v54 = vadd.f32 %v4304_v52, %v3974_v51  ;;  %v1953_v55 = vpop.f32.mrb[17].mxu0 }
 0x918   :  { %v1954_v57 = vadd.f32 %v3974_v51, %v1953_v55 }
 0x919   :  { %v1963_v0 = vadd.f32 %v1959_v54, %v1774_v39 }
 0x91a   :  { %v1962_v1 = vadd.f32 %v1954_v57, %v1773_v37 }
 0x91b   :  { %v1971_v2 = vsel %vm176_vm7, %v1963_v0, 0.0 }
 0x91c   :  { %1972 = vadd.xlane.f32.xlu0 %v1971_v2  ;;  %v1968_v3 = vsel %vm176_vm7, %v1962_v1, 0.0 }
 0x91d   :  { %1969 = vadd.xlane.f32.xlu1 %v1968_v3 }
 0x9a9   :  { %v1973_v4 = vpop.xlane.xlu0 %1972 }
 0x9aa   :  { %v1975_v5 = vmul.f32 0.03125, %v1973_v4  ;;  %v1970_v6 = vpop.xlane.xlu1 %1969 }
 0x9ab   :  { %v1974_v7 = vmul.f32 0.03125, %v1970_v6 }
 0x9ac   :  { %v1977_v8 = vsub.f32 %v1963_v0, %v1975_v5 }
 0x9ad   :  { %v1976_v9 = vsub.f32 %v1962_v1, %v1974_v7 }
 0x9ae   :  { %v1979_v10 = vmul.f32 %v1977_v8, %v1977_v8 }
 0x9af   :  { %v1978_v11 = vmul.f32 %v1976_v9, %v1976_v9 }
 0x9b0   :  { %v1983_v58 = vsel %vm176_vm7, %v1979_v10, 0.0 }
 0x9b1   :  { %1984 = vadd.xlane.f32.xlu0 %v1983_v58  ;;  %v1980_v12 = vsel %vm176_vm7, %v1978_v11, 0.0 }
 0x9b2   :  { %1981 = vadd.xlane.f32.xlu1 %v1980_v12 }
 0xa3e   :  { %v1985_v60 = vpop.xlane.xlu0 %1984 }
 0xa3f   :  { %v1987_v13 = vmul.f32 0.03125, %v1985_v60  ;;  %v1982_v14 = vpop.xlane.xlu1 %1981 }
 0xa40   :  { %v1986_v15 = vmul.f32 0.03125, %v1982_v14 }
 0xa41   :  { %v1989_v16 = vadd.f32 1e-05, %v1987_v13 }
 0xa42   :  { %v1988_v17 = vadd.f32 1e-05, %v1986_v15 }
 0xa43   :  { %4566 = vrsqrt.f32 %v1989_v16 }
 0xa44   :  { %4568 = vrsqrt.f32 %v1988_v17 }
 0xa4d   :  { %v4567_v19 = vpop.eup %4566 }
 0xa4e   :  { %v4569_v21 = vpop.eup %4568  ;;  %v1993_v22 = vmul.f32 %v4567_v19, %v1977_v8 }
 0xa4f   :  { %v1992_v23 = vmul.f32 %v4569_v21, %v1976_v9 }
 0xa50   :  { %v2001_v26 = vmul.f32 %v3979_v20, %v1993_v22 }
 0xa51   :  { %v2000_v27 = vmul.f32 %v3979_v20, %v1992_v23 }
 0xa52   :  { %v5131_v29 = vadd.f32 %v3980_v25, %v2001_v26 }
 0xa53   :  { %v5129_v28 = vadd.f32 %v3980_v25, %v2000_v27 }
 0xa55   :  { %4313 = vmatprep.mubr.msk.f32.mxu1 %vm176_vm7, %v5129_v28 }
 0xa56   :  { %4314 = vmatmul.mubr.msk.f32.vlgmr.msra.gmra.mrb[22].mxu1 %vm176_vm7, %v5131_v29 }
 0xa57   :  { %4318 = vmatprep.mubr.msk.f32.mxu1 %vm4656_vm8, %v4653_v56 }
 0xb29   :  { %v4315_v31 = vpop.f32.mrb[22].mxu1 }
 0xb2a   :  { %v5142_v32 = vadd.f32 %v4315_v31, %v3986_v30  ;;  %v2092_v33 = vpop.f32.mrb[23].mxu1 }
 0xb2b   :  { %v5144_v34 = vadd.f32 %v3986_v30, %v2092_v33 }
 0xb2c   :  { %2105 = vrot.lane.b32.xlu0 %v5142_v32, %s4655_s16 }
 0xb2d   :  { %2103 = vrot.lane.b32.xlu1 %v5144_v34, %s4655_s16 }
 0xb30   :  { %2111 = vrot.lane.b32.xlu0 %v5144_v34, %s4657_s0 }
 0xb31   :  { %2107 = vrot.lane.b32.xlu1 %v5144_v34, %s4654_s3 }
 0xb34   :  { %2115 = vrot.lane.b32.xlu0 %v5144_v34, %s4658_s18 }
 0xb35   :  { %2109 = vrot.lane.b32.xlu1 %v5142_v32, %s4654_s3 }
 0xb39   :  { %2113 = vrot.lane.b32.xlu1 %v5142_v32, %s4657_s0 }
 0xb3d   :  { %2191 = vrot.lane.b32.xlu1 %v5142_v32, %s4658_s18 }
 0xb9e   :  { %v5162_v35 = vpop.permute.xlu0 %2105 }
 0xb9f   :  { %2343 = vrot.lane.b32.xlu1 %v5162_v35, %s4658_s18  ;;  %v5166_v36 = vpop.permute.xlu1 %2103 }
 0xba0   :  { %2267 = vrot.lane.b32.xlu0 %v5166_v36, %s4658_s18 }
 0xba2   :  { %v5170_v37 = vpop.permute.xlu0 %2111 }
 0xba3   :  { %v5172_v38 = vpop.permute.xlu1 %2107 }
 0xba4   :  { %2419 = vrot.lane.b32.xlu0 %v5172_v38, %s4658_s18 }
 0xba6   :  { %v2116_v39 = vpop.permute.xlu0 %2115 }
 0xba7   :  { %4317 = vmatpush3.xpose.msk.msra.mxu1 %vm274_vm9, %v2116_v39  ;;  %v5177_v41 = vpop.permute.xlu1 %2109 }
 0xba8   :  { %2571 = vrot.lane.b32.xlu0 %v5170_v37, %s4658_s18  ;;  %2495 = vrot.lane.b32.xlu1 %v5177_v41, %s4658_s18 }
 0xba9   :  { %4321 = vmatprep.subr.mxu1 %v4653_v56 }
 0xbaa   :  { %4319 = vmatmul.mubr.msk.f32.vlgmr.msra.gmra.mrb[24].mxu1 %vm274_vm9, %v5144_v34 }
 0xbab   :  { %v5186_v42 = vpop.permute.xlu1 %2113  ;;  %4323 = vmatprep.mubr.msk.f32.mxu1 %vm4656_vm8, %v4653_v56 }
 0xbac   :  { %2647 = vrot.lane.b32.xlu1 %v5186_v42, %s4658_s18 }
 0xbaf   :  { %v2192_v43 = vpop.permute.xlu1 %2191 }
 0xbb0   :  { %4322 = vmatpush3.xpose.msk.msra.mxu1 %vm274_vm9, %v2192_v43 }
 0xbb1   :  { %4331 = vmatprep.subr.mxu1 %v4653_v56 }
 0xbb3   :  { %4324 = vmatmul.mubr.msk.f32.vlgmr.msra.gmra.mrb[26].mxu1 %vm274_vm9, %v5142_v32 }
 0xbb4   :  { %4333 = vmatprep.mubr.msk.f32.mxu1 %vm4656_vm8, %v4653_v56 }
 0xc11   :  { %v2344_v44 = vpop.permute.xlu1 %2343 }
 0xc12   :  { %v2268_v45 = vpop.permute.xlu0 %2267  ;;  %4332 = vmatpush3.xpose.msk.msra.mxu1 %vm274_vm9, %v2344_v44 }
 0xc13   :  { %4327 = vmatpush3.xpose.msk.msra.mxu0 %vm274_vm9, %v2268_v45  ;;  %4341 = vmatprep.subr.mxu1 %v4653_v56 }
 0xc14   :  { %4336 = vmatprep.subr.mxu0 %v4653_v56 }
 0xc15   :  { %4334 = vmatmul.mubr.msk.f32.vlgmr.msra.gmra.mrb[28].mxu1 %vm274_vm9, %v5162_v35 }
 0xc16   :  { %4329 = vmatmul.mubr.msk.f32.vlgmr.msra.gmra.mrb[18].mxu0 %vm274_vm9, %v5166_v36  ;;  %v2420_v46 = vpop.permute.xlu0 %2419  ;;  %4343 = vmatprep.mubr.msk.f32.mxu1 %vm4656_vm8, %v4653_v56 }
 0xc17   :  { %4337 = vmatpush3.xpose.msk.msra.mxu0 %vm274_vm9, %v2420_v46  ;;  %4338 = vmatprep.mubr.msk.f32.mxu0 %vm4656_vm8, %v4653_v56 }
 0xc18   :  { %4346 = vmatprep.subr.mxu0 %v4653_v56 }
 0xc1a   :  { %4339 = vmatmul.mubr.msk.f32.vlgmr.msra.gmra.mrb[20].mxu0 %vm274_vm9, %v5172_v38  ;;  %v2572_v47 = vpop.permute.xlu0 %2571  ;;  %v2496_v48 = vpop.permute.xlu1 %2495 }
 0xc1b   :  { %4342 = vmatpush3.xpose.msk.msra.mxu1 %vm274_vm9, %v2496_v48  ;;  %4347 = vmatpush3.xpose.msk.msra.mxu0 %vm274_vm9, %v2572_v47 }
 0xc1c   :  { %4348 = vmatprep.mubr.msk.f32.mxu0 %vm4656_vm8, %v4653_v56  ;;  %4351 = vmatprep.subr.mxu1 %v4653_v56 }
 0xc1d   :  { %4356 = vmatprep.subr.mxu0 %v4653_v56 }
 0xc1e   :  { %4344 = vmatmul.mubr.msk.f32.vlgmr.msra.gmra.mrb[30].mxu1 %vm274_vm9, %v5177_v41  ;;  %4349 = vmatmul.mubr.msk.f32.vlgmr.msra.gmra.mrb[22].mxu0 %vm274_vm9, %v5170_v37  ;;  %v2648_v49 = vpop.permute.xlu1 %2647 }
 0xc1f   :  { %4352 = vmatpush3.xpose.msk.msra.mxu1 %vm274_vm9, %v2648_v49  ;;  %4353 = vmatprep.mubr.msk.f32.mxu1 %vm4656_vm8, %v4653_v56 }
 0xc20   :  { %4361 = vmatprep.subr.mxu1 %v4653_v56  ;;  %4358 = vmatprep.mubr.msk.f32.mxu0 %vm4656_vm8, %v4653_v56 }
 0xc22   :  { %4354 = vmatmul.mubr.msk.f32.vlgmr.msra.gmra.mrb[32].mxu1 %vm274_vm9, %v5186_v42 }
 0xc23   :  { %4363 = vmatprep.mubr.msk.f32.mxu1 %vm4656_vm8, %v4653_v56 }
 0xc7d   :  { %v2187_v50 = vpop.f32.mrb[24].mxu1 }
 0xc7e   :  { %v2723_v51 = vmul.f32 0.35355338, %v2187_v50  ;;  %v4320_v52 = vpop.f32.mrb[25].mxu1 }
 0xc80   :  { %v2731_v54 = vadd.f32 %v2723_v51, %v4934_v18 }
 0xc82   :  { %v2739_v55 = vsel %vm274_vm9, %v2731_v54, -inf }
 0xc83   :  { %2740 = vmax.xlane.f32.xlu0 %v2739_v55 }
 0xc86   :  { %v2263_v57 = vpop.f32.mrb[26].mxu1 }
 0xc87   :  { %v2724_v0 = vmul.f32 0.35355338, %v2263_v57  ;;  %v4325_v1 = vpop.f32.mrb[27].mxu1 }
 0xc89   :  { %v2732_v2 = vadd.f32 %v2724_v0, %v4937_v24 }
 0xc8b   :  { %v2742_v3 = vsel %vm274_vm9, %v2732_v2, -inf }
 0xc8c   :  { %2743 = vmax.xlane.f32.xlu1 %v2742_v3 }
 0xce8   :  { %v2415_v4 = vpop.f32.mrb[28].mxu1 }
 0xce9   :  { %v2726_v5 = vmul.f32 0.35355338, %v2415_v4  ;;  %v2339_v6 = vpop.f32.mrb[18].mxu0  ;;  %v4335_v7 = vpop.f32.mrb[29].mxu1 }
 0xcea   :  { %v2725_v8 = vmul.f32 0.35355338, %v2339_v6  ;;  %v4330_v9 = vpop.f32.mrb[19].mxu0 }
 0xceb   :  { %v2734_v58 = vadd.f32 %v2726_v5, %v4937_v24 }
 0xcec   :  { %v2733_v10 = vadd.f32 %v2725_v8, %v4934_v18 }
 0xced   :  { %v2491_v11 = vpop.f32.mrb[20].mxu0  ;;  %v2748_v62 = vsel %vm274_vm9, %v2734_v58, -inf }
 0xcee   :  { %v2727_v12 = vmul.f32 0.35355338, %v2491_v11  ;;  %v4340_v53 = vpop.f32.mrb[21].mxu0  ;;  %v2745_v40 = vsel %vm274_vm9, %v2733_v10, -inf }
 0xcef   :  { %2746 = vmax.xlane.f32.xlu0 %v2745_v40 }
 0xcf0   :  { %v2735_v61 = vadd.f32 %v2727_v12, %v4934_v18 }
 0xcf1   :  { %v2567_v63 = vpop.f32.mrb[30].mxu1  ;;  %v2643_v59 = vpop.f32.mrb[22].mxu0 }
 0xcf2   :  { %v2728_v60 = vmul.f32 0.35355338, %v2567_v63  ;;  %v2729_v13 = vmul.f32 0.35355338, %v2643_v59  ;;  %v4345_v14 = vpop.f32.mrb[31].mxu1  ;;  %v4350_v15 = vpop.f32.mrb[23].mxu0 }
 0xcf3   :  { %v2751_v16 = vsel %vm274_vm9, %v2735_v61, -inf  ;;  %2749 = vmax.xlane.f32.xlu0 %v2748_v62 }
 0xcf4   :  { %2752 = vmax.xlane.f32.xlu1 %v2751_v16  ;;  %v2737_v17 = vadd.f32 %v2729_v13, %v4934_v18  ;;  %v2736_v19 = vadd.f32 %v2728_v60, %v4937_v24 }
 0xcf5   :  { %v2719_v20 = vpop.f32.mrb[32].mxu1 }
 0xcf6   :  { %v2730_v21 = vmul.f32 0.35355338, %v2719_v20  ;;  %v4355_v22 = vpop.f32.mrb[33].mxu1  ;;  %v2757_v23 = vsel %vm274_vm9, %v2737_v17, -inf  ;;  %v2754_v25 = vsel %vm274_vm9, %v2736_v19, -inf }
 0xcf7   :  { %2755 = vmax.xlane.f32.xlu0 %v2754_v25 }
 0xcf8   :  { %2758 = vmax.xlane.f32.xlu1 %v2757_v23  ;;  %v2738_v26 = vadd.f32 %v2730_v21, %v4937_v24 }
 0xcfa   :  { %v2760_v27 = vsel %vm274_vm9, %v2738_v26, -inf }
 0xcfb   :  { %2761 = vmax.xlane.f32.xlu0 %v2760_v27 }
 0xd09   :  { %2827 = vrot.lane.b32.xlu1 %v5144_v34, %s4659_s1 }
 0xd0d   :  { %2979 = vrot.lane.b32.xlu1 %v5166_v36, %s4659_s1 }
 0xd10   :  { %v2741_v30 = vpop.xlane.xlu0 %2740 }
 0xd11   :  { %3055 = vrot.lane.b32.xlu1 %v5162_v35, %s4659_s1  ;;  %2903 = vrot.lane.b32.xlu0 %v5142_v32, %s4659_s1  ;;  %v2763_v33 = vsub.f32 %v2731_v54, %v2741_v30 }
 0xd13   :  { %v2771_v34 = vmul.f32 1.442695, %v2763_v33 }
 0xd15   :  { %3207 = vrot.lane.b32.xlu1 %v5177_v41, %s4659_s1  ;;  %3131 = vrot.lane.b32.xlu0 %v5172_v38, %s4659_s1 }
 0xd19   :  { %v2744_v18 = vpop.xlane.xlu1 %2743 }
 0xd1a   :  { %v2764_v24 = vsub.f32 %v2732_v2, %v2744_v18 }
 0xd1c   :  { %v2773_v31 = vmul.f32 1.442695, %v2764_v24 }
 0xd1e   :  { %4570 = vpow2.f32 %v2773_v31 }
 0xd1f   :  { %4572 = vpow2.f32 %v2771_v34 }
 0xd28   :  { %v5262_v36 = vpop.eup %4570 }
 0xd29   :  { %v2790_v35 = vsel %vm274_vm9, %v5262_v36, 0.0  ;;  %v5266_v32 = vpop.eup %4572 }
 0xd2a   :  { %v2787_v39 = vsel %vm274_vm9, %v5266_v32, 0.0 }
 0xd34   :  { %2791 = vadd.xlane.f32.xlu0 %v2790_v35 }
 0xd39   :  { %2788 = vadd.xlane.f32.xlu1 %v2787_v39 }
 0xd7c   :  { %v2747_v38 = vpop.xlane.xlu0 %2746 }
 0xd7d   :  { %v2765_v41 = vsub.f32 %v2733_v10, %v2747_v38 }
 0xd7f   :  { %v2775_v43 = vmul.f32 1.442695, %v2765_v41 }
 0xd80   :  { %v2750_v44 = vpop.xlane.xlu0 %2749 }
 0xd81   :  { %4574 = vpow2.f32 %v2775_v43  ;;  %v2766_v45 = vsub.f32 %v2734_v58, %v2750_v44  ;;  %v2753_v46 = vpop.xlane.xlu1 %2752 }
 0xd82   :  { %v2767_v47 = vsub.f32 %v2735_v61, %v2753_v46  ;;  %v4013_v46 = vld [vmem:[%s5439_s5 + $0x28] sm:$0xff] }
 0xd83   :  { %v2777_v48 = vmul.f32 1.442695, %v2766_v45 }
 0xd84   :  { %v2779_v49 = vmul.f32 1.442695, %v2767_v47  ;;  %v2756_v50 = vpop.xlane.xlu0 %2755  ;;  %v4014_v47 = vld [vmem:[%s5439_s5 + $0x30] sm:$0xff] }
 0xd85   :  { %4576 = vpow2.f32 %v2777_v48  ;;  %v2768_v51 = vsub.f32 %v2736_v19, %v2756_v50  ;;  %v2759_v52 = vpop.xlane.xlu1 %2758  ;;  %v4485_v48 = vpack.c.bf16 %v4014_v47, %v4013_v46 }
 0xd86   :  { %4578 = vpow2.f32 %v2779_v49  ;;  %v2769_v54 = vsub.f32 %v2737_v17, %v2759_v52  ;;  %v4016_v49 = vld [vmem:[%s5439_s5 + $0x40] sm:$0xff] }
 0xd87   :  { %v2781_v55 = vmul.f32 1.442695, %v2768_v51 }
 0xd88   :  { %v2783_v57 = vmul.f32 1.442695, %v2769_v54  ;;  %v2762_v0 = vpop.xlane.xlu0 %2761 }
 0xd89   :  { %4580 = vpow2.f32 %v2781_v55  ;;  %v2770_v1 = vsub.f32 %v2738_v26, %v2762_v0  ;;  %v2828_v2 = vpop.permute.xlu1 %2827 }
 0xd8a   :  { %4582 = vpow2.f32 %v2783_v57  ;;  %4357 = vmatpush3.msra.mxu0 %v2828_v2 }
 0xd8b   :  { %v4575_v3 = vpop.eup %4574  ;;  %v2785_v4 = vmul.f32 1.442695, %v2770_v1  ;;  %4366 = vmatprep.subr.mxu0 %v4653_v56 }
 0xd8c   :  { %v2904_v5 = vpop.permute.xlu0 %2903  ;;  %v2793_v6 = vsel %vm274_vm9, %v4575_v3, 0.0 }
 0xd8d   :  { %4584 = vpow2.f32 %v2785_v4  ;;  %2794 = vadd.xlane.f32.xlu1 %v2793_v6  ;;  %4362 = vmatpush3.msra.mxu1 %v2904_v5  ;;  %v2980_v63 = vpop.permute.xlu1 %2979 }
 0xd8e   :  { %4371 = vmatprep.subr.mxu1 %v4653_v56 }
 0xd8f   :  { %v4577_v7 = vpop.eup %4576 }
 0xd90   :  { %v4579_v8 = vpop.eup %4578  ;;  %v2796_v9 = vsel %vm274_vm9, %v4577_v7, 0.0  ;;  %v3132_v62 = vpop.permute.xlu0 %3131 }
 0xd91   :  { %2797 = vadd.xlane.f32.xlu0 %v2796_v9  ;;  %v2799_v10 = vsel %vm274_vm9, %v4579_v8, 0.0  ;;  %v3056_v59 = vpop.permute.xlu1 %3055 }
 0xd92   :  { %2800 = vadd.xlane.f32.xlu1 %v2799_v10 }
 0xd93   :  { %v4581_v11 = vpop.eup %4580 }
 0xd94   :  { %v4583_v58 = vpop.eup %4582  ;;  %v2802_v12 = vsel %vm274_vm9, %v4581_v11, 0.0 }
 0xd95   :  { %2803 = vadd.xlane.f32.xlu0 %v2802_v12  ;;  %v2805_v53 = vsel %vm274_vm9, %v4583_v58, 0.0  ;;  %v3208_v13 = vpop.permute.xlu1 %3207 }
 0xd96   :  { %2806 = vadd.xlane.f32.xlu1 %v2805_v53 }
 0xd97   :  { %v5277_v40 = vpop.eup %4584 }
 0xd98   :  { %v2808_v61 = vsel %vm274_vm9, %v5277_v40, 0.0 }
 0xd99   :  { %2809 = vadd.xlane.f32.xlu0 %v2808_v61 }
 0xda7   :  { %3359 = vrot.lane.b32.xlu1 %v5186_v42, %s4659_s1 }
 0xdaf   :  { %3283 = vrot.lane.b32.xlu0 %v5170_v37, %s4659_s1 }
 0xdc1   :  { %v2792_v60 = vpop.xlane.xlu0 %2791 }
 0xdc2   :  { %4586 = vrcp.f32 %v2792_v60 }
 0xdc6   :  { %v2789_v14 = vpop.xlane.xlu1 %2788 }
 0xdc7   :  { %4588 = vrcp.f32 %v2789_v14 }
 0xdcc   :  { %v4587_v15 = vpop.eup %4586 }
 0xdcd   :  { %v2820_v16 = vmul.f32 %v4587_v15, %v5262_v36 }
 0xdcf   :  { %4364 = vmatmul.mubr.msk.f32.vlgmr.msra.gmra.mrb[34].mxu1 %vm274_vm9, %v2820_v16 }
 0xdd0   :  { %4372 = vmatpush3.msra.mxu1 %v3056_v59  ;;  %4373 = vmatprep.mubr.msk.f32.mxu1 %vm4656_vm8, %v4653_v56 }
 0xdd1   :  { %v4589_v42 = vpop.eup %4588  ;;  %4381 = vmatprep.subr.mxu1 %v4653_v56 }
 0xdd2   :  { %v2819_v37 = vmul.f32 %v4589_v42, %v5266_v32 }
 0xdd4   :  { %4359 = vmatmul.mubr.msk.f32.vlgmr.msra.gmra.mrb[24].mxu0 %vm274_vm9, %v2819_v37 }
 0xdd5   :  { %4367 = vmatpush3.msra.mxu0 %v2980_v63  ;;  %4368 = vmatprep.mubr.msk.f32.mxu0 %vm4656_vm8, %v4653_v56 }
 0xdd6   :  { %4376 = vmatprep.subr.mxu0 %v4653_v56 }
 0xe1a   :  { %v2795_v17 = vpop.xlane.xlu1 %2794 }
 0xe1b   :  { %4590 = vrcp.f32 %v2795_v17 }
 0xe1e   :  { %v2798_v19 = vpop.xlane.xlu0 %2797 }
 0xe1f   :  { %4592 = vrcp.f32 %v2798_v19  ;;  %v2801_v20 = vpop.xlane.xlu1 %2800 }
 0xe20   :  { %4594 = vrcp.f32 %v2801_v20 }
 0xe22   :  { %v2804_v21 = vpop.xlane.xlu0 %2803 }
 0xe23   :  { %4596 = vrcp.f32 %v2804_v21  ;;  %v2807_v22 = vpop.xlane.xlu1 %2806 }
 0xe24   :  { %4598 = vrcp.f32 %v2807_v22 }
 0xe25   :  { %v4591_v23 = vpop.eup %4590 }
 0xe26   :  { %v2821_v25 = vmul.f32 %v4591_v23, %v4575_v3  ;;  %v2810_v26 = vpop.xlane.xlu0 %2809 }
 0xe27   :  { %4600 = vrcp.f32 %v2810_v26  ;;  %v3360_v32 = vpop.permute.xlu1 %3359 }
 0xe28   :  { %4369 = vmatmul.mubr.msk.f32.vlgmr.msra.gmra.mrb[26].mxu0 %vm274_vm9, %v2821_v25 }
 0xe29   :  { %v4593_v27 = vpop.eup %4592  ;;  %4377 = vmatpush3.msra.mxu0 %v3132_v62  ;;  %4378 = vmatprep.mubr.msk.f32.mxu0 %vm4656_vm8, %v4653_v56  ;;  %v4018_v62 = vld [vmem:[%s5439_s5 + $0x48] ss:$0 sm:$0xff] }
 0xe2a   :  { %v4595_v18 = vpop.eup %4594  ;;  %v2822_v24 = vmul.f32 %v4593_v27, %v4577_v7  ;;  %4386 = vmatprep.subr.mxu0 %v4653_v56  ;;  %v3284_v31 = vpop.permute.xlu0 %3283 }
 0xe2b   :  { %v2823_v30 = vmul.f32 %v4595_v18, %v4579_v8 }
 0xe2c   :  { %4374 = vmatmul.mubr.msk.f32.vlgmr.msra.gmra.mrb[36].mxu1 %vm274_vm9, %v2822_v24  ;;  %v4026_v24 = vld [vmem:[%s5440_s6 + $0x30] sm:$0xff] }
 0xe2d   :  { %v4597_v33 = vpop.eup %4596  ;;  %4379 = vmatmul.mubr.msk.f32.vlgmr.msra.gmra.mrb[28].mxu0 %vm274_vm9, %v2823_v30  ;;  %4382 = vmatpush3.msra.mxu1 %v3208_v13 }
 0xe2e   :  { %v4599_v34 = vpop.eup %4598  ;;  %v2824_v36 = vmul.f32 %v4597_v33, %v4581_v11  ;;  %4387 = vmatpush3.msra.mxu0 %v3284_v31  ;;  %4383 = vmatprep.mubr.msk.f32.mxu1 %vm4656_vm8, %v4653_v56  ;;  %v4027_v31 = vld [vmem:[%s5440_s6 + $0x38] sm:$0xff]  ;;  %v4028_v33 = vld [vmem:[%s5440_s6 + $0x40] sm:$0xff] }
 0xe2f   :  { %v2825_v35 = vmul.f32 %v4599_v34, %v4583_v58  ;;  %4388 = vmatprep.mubr.msk.f32.mxu0 %vm4656_vm8, %v4653_v56  ;;  %4391 = vmatprep.subr.mxu1 %v4653_v56  ;;  %v4497_v34 = vpack.c.bf16 %v4028_v33, %v4027_v31  ;;  %v4047_v31 = vld [vmem:[%s5442_s8 + $0x6] ss:$0 sm:$0xff] }
 0xe30   :  { %4384 = vmatmul.mubr.msk.f32.vlgmr.msra.gmra.mrb[38].mxu1 %vm274_vm9, %v2824_v36  ;;  %4486 = vmatprep.subr.bf16.mxu0 %v4485_v48  ;;  %v4030_v36 = vld [vmem:[%s5441_s7 + $0x48] sm:$0xff] }
 0xe31   :  { %v4601_v39 = vpop.eup %4600  ;;  %4389 = vmatmul.mubr.msk.f32.vlgmr.msra.gmra.mrb[30].mxu0 %vm274_vm9, %v2825_v35  ;;  %4392 = vmatpush3.msra.mxu1 %v3360_v32  ;;  %v4031_v35 = vld [vmem:[%s5441_s7 + $0x50] sm:$0xff]  ;;  %v4032_v32 = vld [vmem:[%s5441_s7 + $0x58] sm:$0xff] }
 0xe32   :  { %v2826_v38 = vmul.f32 %v4601_v39, %v5277_v40  ;;  %4393 = vmatprep.mubr.msk.f32.mxu1 %vm4656_vm8, %v4653_v56  ;;  %4488 = vmatpush3.bf16.msra.mxu0 %v4485_v48  ;;  %v4015_v56 = vld [vmem:[%s5439_s5 + $0x38] sm:$0xff]  ;;  %v4501_v39 = vpack.c.bf16 %v4031_v35, %v4030_v36  ;;  %v4048_v36 = vld [vmem:[%s5442_s8 + $0x7] ss:$0 sm:$0xff] }
 0xe33   :  { %v4489_v50 = vpack.c.bf16 %v4016_v49, %v4015_v56 }
 0xe34   :  { %4394 = vmatmul.mubr.msk.f32.vlgmr.msra.gmra.mrb[40].mxu1 %vm274_vm9, %v2826_v38  ;;  %v4033_v38 = vld [vmem:[%s5441_s7 + $0x60] sm:$0xff] }
 0xe35   :  { %4490 = vmatprep.subr.bf16.mxu0 %v4489_v50 }
 0xe36   :  { %4492 = vmatpush3.bf16.msra.mxu0 %v4489_v50 }
 0xe37   :  { %4502 = vmatprep.subr.bf16.mxu0 %v4501_v39 }
 0xea2   :  { %v2975_v41 = vpop.f32.mrb[34].mxu1 }
 0xea3   :  { %v4365_v43 = vpop.f32.mrb[35].mxu1 }
 0xea4   :  { %v4034_v43 = vld [vmem:[%s5441_s7 + $0x68] sm:$0xff] }
 0xea7   :  { %v2899_v44 = vpop.f32.mrb[24].mxu0 }
 0xea8   :  { %v4360_v45 = vpop.f32.mrb[25].mxu0 }
 0xefb   :  { %v3051_v51 = vpop.f32.mrb[26].mxu0 }
 0xefc   :  { %3437 = vrot.lane.b32.xlu0 %v3051_v51, %s4660_s12  ;;  %v4370_v52 = vpop.f32.mrb[27].mxu0 }
 0xefd   :  { %v4023_v52 = vld [vmem:[%s5442_s8 + $0x4] ss:$0 sm:$0xff] }
 0xeff   :  { %v3127_v54 = vpop.f32.mrb[36].mxu1 }
 0xf00   :  { %v3203_v55 = vpop.f32.mrb[28].mxu0  ;;  %3439 = vrot.lane.b32.xlu1 %v3127_v54, %s4660_s12  ;;  %v4375_v57 = vpop.f32.mrb[37].mxu1 }
 0xf01   :  { %3445 = vrot.lane.b32.xlu0 %v3203_v55, %s4661_s27  ;;  %v4380_v0 = vpop.f32.mrb[29].mxu0  ;;  %v4024_v55 = vld [vmem:[%s5442_s8 + $0x5] ss:$0 sm:$0xff] }
 0xf03   :  { %v3279_v1 = vpop.f32.mrb[38].mxu1 }
 0xf04   :  { %v3355_v2 = vpop.f32.mrb[30].mxu0  ;;  %3447 = vrot.lane.b32.xlu1 %v3279_v1, %s4661_s27  ;;  %v4385_v3 = vpop.f32.mrb[39].mxu1 }
 0xf05   :  { %3453 = vrot.lane.b32.xlu0 %v3355_v2, %s4662_s22  ;;  %v4390_v4 = vpop.f32.mrb[31].mxu0 }
 0xf07   :  { %v3431_v5 = vpop.f32.mrb[40].mxu1 }
 0xf08   :  { %3455 = vrot.lane.b32.xlu1 %v3431_v5, %s4662_s22  ;;  %v4395_v6 = vpop.f32.mrb[41].mxu1  ;;  %v4036_v5 = vld [vmem:[%s5441_s7 + $0x78] sm:$0xff] }
 0xf09   :  { %v4037_v6 = vld [vmem:[%s5441_s7 + $0x80] sm:$0xff] }
 0xf6e   :  { %v3438_v7 = vpop.permute.xlu0 %3437 }
 0xf6f   :  { %v3459_v10 = vsel %vm274_vm9, %v2899_v44, %v3438_v7  ;;  %v4035_v44 = vld [vmem:[%s5441_s7 + $0x70] sm:$0xff]  ;;  %v4513_v7 = vpack.c.bf16 %v4037_v6, %v4036_v5  ;;  %v4051_v5 = vld [vmem:[%s5442_s8 + $0x8] ss:$0 sm:$0xff] }
 0xf70   :  { %v4509_v45 = vpack.c.bf16 %v4035_v44, %v4034_v43 }
 0xf72   :  { %v3440_v8 = vpop.permute.xlu1 %3439 }
 0xf73   :  { %v3446_v9 = vpop.permute.xlu0 %3445  ;;  %v3460_v40 = vsel %vm274_vm9, %v2975_v41, %v3440_v8  ;;  %v4505_v41 = vpack.c.bf16 %v4033_v38, %v4032_v32  ;;  %v4039_v8 = vld [vmem:[%s5440_s6 + $0x48] ss:$0 sm:$0xff] }
 0xf74   :  { %v3461_v58 = vsel %vm1631_vm10, %v3459_v10, %v3446_v9 }
 0xf76   :  { %v3448_v11 = vpop.permute.xlu1 %3447 }
 0xf77   :  { %v3454_v12 = vpop.permute.xlu0 %3453  ;;  %v3462_v61 = vsel %vm1631_vm10, %v3460_v40, %v3448_v11  ;;  %v4042_v40 = vld [vmem:[%s5441_s7 + $0x88] ss:$0 sm:$0xff] }
 0xf78   :  { %v3463_v53 = vsel %vm1634_vm11, %v3461_v58, %v3454_v12 }
 0xf79   :  { %4404 = vmatprep.mubr.msk.f32.mxu0 %vm176_vm7, %v3463_v53 }
 0xf7a   :  { %v3456_v63 = vpop.permute.xlu1 %3455 }
 0xf7b   :  { %v3464_v59 = vsel %vm1634_vm11, %v3462_v61, %v3456_v63 }
 0xf7c   :  { %4405 = vmatmul.mubr.msk.f32.vlgmr.msra.gmra.mrb[32].mxu0 %vm176_vm7, %v3464_v59 }
 0xf7d   :  { %4504 = vmatpush3.bf16.msra.mxu0 %v4501_v39 }
 0xf7e   :  { %4506 = vmatprep.subr.bf16.mxu0 %v4505_v41 }
 0xf81   :  { %4508 = vmatpush3.bf16.msra.mxu0 %v4505_v41 }
 0xf82   :  { %4510 = vmatprep.subr.bf16.mxu0 %v4509_v45 }
 0xf85   :  { %4512 = vmatpush3.bf16.msra.mxu0 %v4509_v45 }
 0xf86   :  { %4514 = vmatprep.subr.bf16.mxu0 %v4513_v7 }
 0xf89   :  { %4516 = vmatpush3.bf16.msra.mxu0 %v4513_v7 }
0x104f   :  { %v4406_v60 = vpop.f32.mrb[32].mxu0 }
0x1050   :  { %v3553_v13 = vadd.f32 %v4406_v60, %v4018_v62  ;;  %v3547_v14 = vpop.f32.mrb[33].mxu0 }
0x1051   :  { %v3548_v15 = vadd.f32 %v4018_v62, %v3547_v14 }
0x1052   :  { %v3557_v16 = vadd.f32 %v3553_v13, %v5131_v29 }
0x1053   :  { %v3556_v42 = vadd.f32 %v3548_v15, %v5129_v28  ;;  %v4025_v28 = vld [vmem:[%s5440_s6 + $0x28] sm:$0xff] }
0x1054   :  { %v3565_v37 = vsel %vm176_vm7, %v3557_v16, 0.0  ;;  %v4493_v30 = vpack.c.bf16 %v4026_v24, %v4025_v28 }
0x1055   :  { %3566 = vadd.xlane.f32.xlu1 %v3565_v37  ;;  %v3562_v17 = vsel %vm176_vm7, %v3556_v42, 0.0 }
0x1056   :  { %3563 = vadd.xlane.f32.xlu0 %v3562_v17  ;;  %4494 = vmatprep.subr.bf16.mxu1 %v4493_v30 }
0x1057   :  { %4496 = vmatpush3.bf16.msra.mxu1 %v4493_v30 }
0x1058   :  { %4498 = vmatprep.subr.bf16.mxu1 %v4497_v34 }
0x105b   :  { %4500 = vmatpush3.bf16.msra.mxu1 %v4497_v34 }
0x10e2   :  { %v3567_v19 = vpop.xlane.xlu1 %3566 }
0x10e3   :  { %v3569_v20 = vmul.f32 0.03125, %v3567_v19  ;;  %v3564_v21 = vpop.xlane.xlu0 %3563 }
0x10e4   :  { %v3568_v22 = vmul.f32 0.03125, %v3564_v21 }
0x10e5   :  { %v3571_v23 = vsub.f32 %v3557_v16, %v3569_v20 }
0x10e6   :  { %v3570_v25 = vsub.f32 %v3556_v42, %v3568_v22 }
0x10e7   :  { %v3573_v18 = vmul.f32 %v3571_v23, %v3571_v23 }
0x10e8   :  { %v3572_v26 = vmul.f32 %v3570_v25, %v3570_v25 }
0x10e9   :  { %v3577_v29 = vsel %vm176_vm7, %v3573_v18, 0.0 }
0x10ea   :  { %v3574_v27 = vsel %vm176_vm7, %v3572_v26, 0.0 }
0x10eb   :  { %3575 = vadd.xlane.f32.xlu0 %v3574_v27 }
0x10ef   :  { %3578 = vadd.xlane.f32.xlu0 %v3577_v29 }
0x1178   :  { %v3576_v46 = vpop.xlane.xlu0 %3575 }
0x1179   :  { %v3580_v47 = vmul.f32 0.03125, %v3576_v46 }
0x117b   :  { %v3582_v48 = vadd.f32 1e-05, %v3580_v47 }
0x117c   :  { %v3579_v56 = vpop.xlane.xlu0 %3578 }
0x117d   :  { %4602 = vrsqrt.f32 %v3582_v48  ;;  %v3581_v49 = vmul.f32 0.03125, %v3579_v56 }
0x117f   :  { %v3583_v50 = vadd.f32 1e-05, %v3581_v49 }
0x1181   :  { %4604 = vrsqrt.f32 %v3583_v50 }
0x1187   :  { %v4603_v51 = vpop.eup %4602 }
0x1188   :  { %v3586_v54 = vmul.f32 %v4603_v51, %v3570_v25 }
0x118a   :  { %v3594_v57 = vmul.f32 %v4023_v52, %v3586_v54 }
0x118b   :  { %v4605_v0 = vpop.eup %4604 }
0x118c   :  { %v3587_v1 = vmul.f32 %v4605_v0, %v3571_v23  ;;  %v3602_v2 = vadd.f32 %v4024_v55, %v3594_v57 }
0x118e   :  { %v3595_v3 = vmul.f32 %v4023_v52, %v3587_v1  ;;  %4415 = vmatprep.mubr.msk.f32.mxu1 %vm176_vm7, %v3602_v2 }
0x1190   :  { %v3603_v4 = vadd.f32 %v4024_v55, %v3595_v3 }
0x1192   :  { %4416 = vmatmul.mubr.msk.f32.vlgmr.msra.gmra.mrb[42].mxu1 %vm176_vm7, %v3603_v4 }
0x1265   :  { %v4417_v9 = vpop.f32.mrb[42].mxu1 }
0x1266   :  { %v3702_v10 = vadd.f32 %v4417_v9, %v4039_v8  ;;  %v3696_v11 = vpop.f32.mrb[43].mxu1 }
0x1267   :  { %v3697_v58 = vadd.f32 %v4039_v8, %v3696_v11  ;;  %v4052_v8 = vld [vmem:[%s5442_s8 + $0x9] ss:$0 sm:$0xff] }
0x1268   :  { %v3706_v53 = vmax.f32 %v3702_v10, 0.0 }
0x1269   :  { %v3705_v12 = vmax.f32 %v3697_v58, 0.0 }
0x126b   :  { %4434 = vmatprep.mubr.msk.f32.mxu0 %vm1880_vm12, %v3705_v12 }
0x126c   :  { %4435 = vmatmul.mubr.msk.f32.vlgmr.msra.gmra.mrb[34].mxu0 %vm1880_vm12, %v3706_v53 }
0x133f   :  { %v4436_v61 = vpop.f32.mrb[34].mxu0 }
0x1340   :  { %v3789_v63 = vadd.f32 %v4436_v61, %v4042_v40  ;;  %v3783_v59 = vpop.f32.mrb[35].mxu0 }
0x1341   :  { %v3784_v62 = vadd.f32 %v4042_v40, %v3783_v59 }
0x1342   :  { %v3793_v60 = vadd.f32 %v3789_v63, %v3603_v4 }
0x1343   :  { %v3792_v13 = vadd.f32 %v3784_v62, %v3602_v2 }
0x1344   :  { %v3801_v14 = vsel %vm176_vm7, %v3793_v60, 0.0 }
0x1345   :  { %3802 = vadd.xlane.f32.xlu0 %v3801_v14  ;;  %v3798_v15 = vsel %vm176_vm7, %v3792_v13, 0.0 }
0x1346   :  { %3799 = vadd.xlane.f32.xlu1 %v3798_v15 }
0x13d2   :  { %v3803_v16 = vpop.xlane.xlu0 %3802 }
0x13d3   :  { %v3805_v42 = vmul.f32 0.03125, %v3803_v16  ;;  %v3800_v37 = vpop.xlane.xlu1 %3799 }
0x13d4   :  { %v3804_v17 = vmul.f32 0.03125, %v3800_v37 }
0x13d5   :  { %v3807_v19 = vsub.f32 %v3793_v60, %v3805_v42 }
0x13d6   :  { %v3806_v20 = vsub.f32 %v3792_v13, %v3804_v17 }
0x13d7   :  { %v3809_v21 = vmul.f32 %v3807_v19, %v3807_v19 }
0x13d8   :  { %v3808_v22 = vmul.f32 %v3806_v20, %v3806_v20 }
0x13d9   :  { %v3813_v23 = vsel %vm176_vm7, %v3809_v21, 0.0 }
0x13da   :  { %3814 = vadd.xlane.f32.xlu0 %v3813_v23  ;;  %v3810_v25 = vsel %vm176_vm7, %v3808_v22, 0.0 }
0x13db   :  { %3811 = vadd.xlane.f32.xlu1 %v3810_v25 }
0x1467   :  { %v3815_v26 = vpop.xlane.xlu0 %3814 }
0x1468   :  { %v3817_v27 = vmul.f32 0.03125, %v3815_v26  ;;  %v3812_v18 = vpop.xlane.xlu1 %3811 }
0x1469   :  { %v3816_v29 = vmul.f32 0.03125, %v3812_v18 }
0x146a   :  { %v3819_v28 = vadd.f32 1e-05, %v3817_v27 }
0x146b   :  { %v3818_v24 = vadd.f32 1e-05, %v3816_v29 }
0x146c   :  { %4606 = vrsqrt.f32 %v3819_v28 }
0x146d   :  { %4608 = vrsqrt.f32 %v3818_v24 }
0x1476   :  { %v4607_v30 = vpop.eup %4606 }
0x1477   :  { %v4609_v33 = vpop.eup %4608  ;;  %v3823_v34 = vmul.f32 %v4607_v30, %v3807_v19 }
0x1478   :  { %v3822_v35 = vmul.f32 %v4609_v33, %v3806_v20 }
0x1479   :  { %v3831_v32 = vmul.f32 %v4047_v31, %v3823_v34 }
0x147a   :  { %v3830_v39 = vmul.f32 %v4047_v31, %v3822_v35 }
0x147b   :  { %v3839_v38 = vadd.f32 %v4048_v36, %v3831_v32 }
0x147c   :  { %v3838_v41 = vadd.f32 %v4048_v36, %v3830_v39 }
0x147d   :  { %v3847_v43 = vsel %vm176_vm7, %v3839_v38, 0.0 }
0x147e   :  { %3848 = vadd.xlane.f32.xlu0 %v3847_v43  ;;  %v3844_v44 = vsel %vm176_vm7, %v3838_v41, 0.0 }
0x147f   :  { %3845 = vadd.xlane.f32.xlu1 %v3844_v44 }
0x150b   :  { %v3849_v45 = vpop.xlane.xlu0 %3848 }
0x150c   :  { %v3851_v46 = vmul.f32 0.03125, %v3849_v45  ;;  %v3846_v47 = vpop.xlane.xlu1 %3845 }
0x150d   :  { %v3850_v48 = vmul.f32 0.03125, %v3846_v47 }
0x150e   :  { %v3853_v56 = vsub.f32 %v3839_v38, %v3851_v46 }
0x150f   :  { %v3852_v49 = vsub.f32 %v3838_v41, %v3850_v48 }
0x1510   :  { %v3855_v50 = vmul.f32 %v3853_v56, %v3853_v56 }
0x1511   :  { %v3854_v51 = vmul.f32 %v3852_v49, %v3852_v49 }
0x1512   :  { %v3859_v52 = vsel %vm176_vm7, %v3855_v50, 0.0 }
0x1513   :  { %3860 = vadd.xlane.f32.xlu0 %v3859_v52  ;;  %v3856_v54 = vsel %vm176_vm7, %v3854_v51, 0.0 }
0x1514   :  { %3857 = vadd.xlane.f32.xlu1 %v3856_v54 }
0x15a0   :  { %v3861_v55 = vpop.xlane.xlu0 %3860 }
0x15a1   :  { %v3863_v57 = vmul.f32 0.03125, %v3861_v55  ;;  %v3858_v0 = vpop.xlane.xlu1 %3857 }
0x15a2   :  { %v3862_v1 = vmul.f32 0.03125, %v3858_v0 }
0x15a3   :  { %v3865_v2 = vadd.f32 1e-05, %v3863_v57 }
0x15a4   :  { %v3864_v3 = vadd.f32 1e-05, %v3862_v1 }
0x15a5   :  { %4610 = vrsqrt.f32 %v3865_v2 }
0x15a6   :  { %4612 = vrsqrt.f32 %v3864_v3 }
0x15af   :  { %v4611_v4 = vpop.eup %4610 }
0x15b0   :  { %v4613_v6 = vpop.eup %4612  ;;  %v3869_v7 = vmul.f32 %v4611_v4, %v3853_v56 }
0x15b1   :  { %v3868_v9 = vmul.f32 %v4613_v6, %v3852_v49 }
0x15b2   :  { %v3877_v10 = vmul.f32 %v4051_v5, %v3869_v7 }
0x15b3   :  { %v3876_v11 = vmul.f32 %v4051_v5, %v3868_v9 }
0x15b4   :  { %v3885_v58 = vadd.f32 %v4052_v8, %v3877_v10 }
0x15b5   :  { %v3884_v12 = vadd.f32 %v4052_v8, %v3876_v11 }
0x15b6   :  { %3887 = vst.msk [vmem:[#allocation5 + $0x8] sm:$0xff] %vm176_vm7, %v3885_v58 }
0x15b7   :  { %3886 = vst.msk [vmem:[#allocation5] sm:$0xff] %vm176_vm7, %v3884_v12 }
0x15b8   :  { %4637 = shalt.err (!%p4634_p9)
}
0x15b9   :  { %s4638_s4 = scalar_lea.hbm %s5443_s9, 256 }
0x15ba   :  { %p4639_p10 = scmp.ne.s32.totalorder %s5443_s9, %s4638_s4  ;;  %p4642_p11 = scmp.lt.u32.totalorder %s4638_s4, %s5443_s9 }
0x15bc   :  { %p4644_p12 = pnand %p4642_p11, %p4639_p10 }
0x15be   :  { %4647 = shalt.err (!%p4644_p12)
}
0x15bf   :  { %s4664_s1 = smov 128  }
0x15c0   :  { %3899 = dma.vmem_to_hbm [thread:$0]  %s3894_s20, 256, %s5443_s9, [#allocation3], %s4664_s1, %s4664_s1, %s4660_s12  }
0x15c1   :  { %4650 = dma.done.wait [#allocation3], 256  }
0x15c2   :  { %4651 = vsyncadd [#allocation3], 4294967040 }
0x15c3   :  { %3903 = vsyncpa [#allocation3], 1 }
0x15c4   :  { %3904 = vsyncpa [#allocation4], 1 }

</bundles_post_ra>
